<compile_context>
chip_gen: v7x
topology: tpu7x:2x2x1
jax: 0.10.0
libtpu: 0.0.40
codegen_flags: <defaults>
</compile_context>

<pallas_src>
import math
import numpy as np

import jax
import jax.numpy as jnp
from jax import lax
from jax.experimental import pallas as pl
from jax.experimental.pallas import tpu as pltpu

# ----------------------------- config (small, synthetic) ---------------------
PAD = 0
MAX_SEQ_LEN = 8
D_MODEL = 32          # encoder_hidden
N_HEAD = 2            # encoder_head
D_K = D_MODEL // N_HEAD
D_INNER = 64          # conv_filter_size
KERNEL_SIZE = (3, 1)  # conv_kernel_size (odd kernels, 'same' padding)
N_LAYERS = 2          # encoder_layer
SRC_VOCAB = 10        # len(my_symbols) + 1 (synthetic)
BATCH = 2
SEQ = 8
BS = BATCH * SEQ
EPS = 1e-5            # nn.LayerNorm default eps
NEG_BIG = 1e9         # stands in for masked_fill(-inf)


# ----------------------------- positional table -------------------------------
def get_sinusoid_encoding_table(n_position, d_hid, padding_idx=None):
    def cal_angle(position, hid_idx):
        return position / np.power(10000, 2 * (hid_idx // 2) / d_hid)

    table = np.array(
        [[cal_angle(p, j) for j in range(d_hid)] for p in range(n_position)],
        dtype=np.float64,
    )
    table[:, 0::2] = np.sin(table[:, 0::2])
    table[:, 1::2] = np.cos(table[:, 1::2])
    if padding_idx is not None:
        table[padding_idx] = 0.0
    return table.astype(np.float32)


# ----------------------------- in-kernel helpers ------------------------------
def _layer_norm(x, g, b):
    # f32 statistics (VPU/XLU); matches nn.LayerNorm(eps=1e-5)
    mu = jnp.mean(x, axis=-1, keepdims=True)
    var = jnp.mean((x - mu) ** 2, axis=-1, keepdims=True)
    return (x - mu) * lax.rsqrt(var + EPS) * g + b


# ----------------------------- fused encoder kernel ---------------------------
def encoder_kernel(x_ref, abias_ref, rowm_ref, shl_ref, shr_ref,
                   wq_ref, bq_ref, wk_ref, bk_ref, wv_ref, bv_ref,
                   wo_ref, bo_ref, ln1g_ref, ln1b_ref,
                   w1_ref, b1_ref, w2_ref, b2_ref, ln2g_ref, ln2b_ref,
                   out_ref):
    x = x_ref[...]                 # (BS, D) f32 activations, VMEM-resident throughout
    abias = abias_ref[...]         # (BS, BS) additive attn mask (0 / -1e9), f32
    rowm = rowm_ref[...]           # (BS, 1)  1.0 = real token, 0.0 = pad row
    shl = shl_ref[...]             # (BS, BS) "previous token" shift operator (0/1)
    shr = shr_ref[...]             # (BS, BS) "next token"     shift operator (0/1)
    scale = 1.0 / math.sqrt(D_K)

    for l in range(N_LAYERS):      # static unroll; all layer weights already in VMEM
        # ---------------- multi-head self-attention + residual + LN -----------
        xb = x.astype(jnp.bfloat16)                       # one cast, reused for Q/K/V
        acc = jnp.zeros((BS, D_MODEL), jnp.float32)
        for h in range(N_HEAD):                           # per-head weights: no lane
            qh = jnp.dot(xb, wq_ref[l, h],                # slicing, no head concat
                         preferred_element_type=jnp.float32) + bq_ref[l, h]
            kh = jnp.dot(xb, wk_ref[l, h],
                         preferred_element_type=jnp.float32) + bk_ref[l, h]
            vh = jnp.dot(xb, wv_ref[l, h],
                         preferred_element_type=jnp.float32) + bv_ref[l, h]
            # scores: q @ k^T via dot_general (no materialized transpose)
            s = lax.dot_general(qh.astype(jnp.bfloat16), kh.astype(jnp.bfloat16),
                                (((1,), (1,)), ((), ())),
                                preferred_element_type=jnp.float32) * scale + abias
            s = s - jnp.max(s, axis=-1, keepdims=True)    # f32 softmax stats
            e = jnp.exp(s)
            attn = e * pl.reciprocal(jnp.sum(e, axis=-1, keepdims=True), approx=True)
            ctx = jnp.dot(attn.astype(jnp.bfloat16), vh.astype(jnp.bfloat16),
                          preferred_element_type=jnp.float32)
            acc = acc + jnp.dot(ctx.astype(jnp.bfloat16), wo_ref[l, h],
                                preferred_element_type=jnp.float32)
        o = acc + bo_ref[l]
        x = _layer_norm(o + x, ln1g_ref[l], ln1b_ref[l]) * rowm   # residual+LN+maskfill

        # ---------------- conv FFN (k=3 as one im2col matmul, k=1 as matmul) --
        # boundary-aware +/-1 shifts as 0/1 operators on the MXU; exact (no rounding),
        # handles per-sequence zero padding and cross-batch isolation in one op.
        xm1 = jnp.dot(shl, x, preferred_element_type=jnp.float32)   # x[t-1] (0 at seq start)
        xp1 = jnp.dot(shr, x, preferred_element_type=jnp.float32)   # x[t+1] (0 at seq end)
        xcat = jnp.concatenate([xm1, x, xp1], axis=-1).astype(jnp.bfloat16)  # (BS, 3D)
        y = jnp.dot(xcat, w1_ref[l], preferred_element_type=jnp.float32) + b1_ref[l]
        y = jnp.maximum(y, 0.0).astype(jnp.bfloat16)                 # ReLU
        z = jnp.dot(y, w2_ref[l], preferred_element_type=jnp.float32) + b2_ref[l]
        x = _layer_norm(z + x, ln2g_ref[l], ln2b_ref[l]) * rowm      # residual+LN+maskfill

    out_ref[...] = x


# ----------------------------- wrapper glue ------------------------------------
def _build_aux(mask):
    """Precompute (in the wrapper, once) the additive attention bias, the pad row
    mask (already column-shaped, no in-kernel transpose) and the boundary-aware
    shift operators used by the im2col conv."""
    B, S = mask.shape
    n = B * S
    key_pad = mask.reshape(n)
    batch_id = jnp.repeat(jnp.arange(B), S)
    same_batch = batch_id[:, None] == batch_id[None, :]
    allowed = same_batch & (~key_pad)[None, :]
    abias = jnp.where(allowed, 0.0, -NEG_BIG).astype(jnp.float32)          # (n, n)
    rowm = (~key_pad).astype(jnp.float32)[:, None]                         # (n, 1)
    pos = jnp.arange(n)
    shl = ((pos[:, None] - 1 == pos[None, :]) &
           (pos[:, None] % S != 0)).astype(jnp.float32)                    # prev token
    shr = ((pos[:, None] + 1 == pos[None, :]) &
           (pos[:, None] % S != S - 1)).astype(jnp.float32)                # next token
    return abias, rowm, shl, shr


def _pack_kernel_params(params):
    """Stack per-layer weights along a leading layer axis; split attention weights
    per head; reshape the k=3 conv to an im2col matrix; cast MXU operands to bf16
    (biases / LayerNorm params stay f32)."""
    H, DK, D, DI = N_HEAD, D_K, D_MODEL, D_INNER
    k1, k2 = KERNEL_SIZE
    assert k1 == 3 and k2 == 1, "im2col packing written for kernel_size (3, 1)"

    def per_layer(lp):
        return dict(
            wq=lp['wq'].reshape(D, H, DK).transpose(1, 0, 2).astype(jnp.bfloat16),
            bq=lp['bq'].reshape(H, 1, DK),
            wk=lp['wk'].reshape(D, H, DK).transpose(1, 0, 2).astype(jnp.bfloat16),
            bk=lp['bk'].reshape(H, 1, DK),
            wv=lp['wv'].reshape(D, H, DK).transpose(1, 0, 2).astype(jnp.bfloat16),
            bv=lp['bv'].reshape(H, 1, DK),
            wo=lp['wo'].reshape(H, DK, D).astype(jnp.bfloat16),
            bo=lp['bo'],
            ln1g=lp['ln1_g'], ln1b=lp['ln1_b'],
            w1=lp['w1'].reshape(k1 * D, DI).astype(jnp.bfloat16),   # im2col weight
            b1=lp['b1'],
            w2=lp['w2'].reshape(DI, D).astype(jnp.bfloat16),        # k=1 conv == matmul
            b2=lp['b2'],
            ln2g=lp['ln2_g'], ln2b=lp['ln2_b'],
        )

    per = [per_layer(lp) for lp in params['layers']]
    names = ['wq', 'bq', 'wk', 'bk', 'wv', 'bv', 'wo', 'bo',
             'ln1g', 'ln1b', 'w1', 'b1', 'w2', 'b2', 'ln2g', 'ln2b']
    return [jnp.stack([p[n] for p in per], axis=0) for n in names]


def encoder_pallas(src_seq, mask, params, pos_table):
    B, S = src_seq.shape
    # glue: embedding gather (padding_idx row is zero) + positional encoding
    x = (params['emb'][src_seq] + pos_table[None, :S, :]).reshape(B * S, D_MODEL)
    x = x.astype(jnp.float32)
    abias, rowm, shl, shr = _build_aux(mask)
    stacked = _pack_kernel_params(params)

    out = pl.pallas_call(
        encoder_kernel,
        out_shape=jax.ShapeDtypeStruct((B * S, D_MODEL), jnp.float32),
        compiler_params=pltpu.CompilerParams(vmem_limit_bytes=32 * 1024 * 1024),
    )(x, abias, rowm, shl, shr, *stacked)
    return out.reshape(B, S, D_MODEL)


# ----------------------------- pure-JAX reference -----------------------------
def _ln_ref(x, g, b):
    mu = jnp.mean(x, axis=-1, keepdims=True)
    var = jnp.mean((x - mu) ** 2, axis=-1, keepdims=True)
    return (x - mu) / jnp.sqrt(var + EPS) * g + b


def _conv1d_ref(x, w, b):
    k = w.shape[0]
    pad = (k - 1) // 2
    S = x.shape[1]
    xp = jnp.pad(x, ((0, 0), (pad, pad), (0, 0)))
    acc = jnp.zeros(x.shape[:2] + (w.shape[2],), jnp.float32) + b
    for j in range(k):
        acc = acc + xp[:, j:j + S, :] @ w[j]
    return acc


def encoder_ref(src_seq, mask, params, pos_table):
    B, S = src_seq.shape
    x = params['emb'][src_seq] + pos_table[None, :S, :]
    m = mask.astype(jnp.float32)
    for lp in params['layers']:
        residual = x
        q = (x @ lp['wq'] + lp['bq']).reshape(B, S, N_HEAD, D_K)
        k = (x @ lp['wk'] + lp['bk']).reshape(B, S, N_HEAD, D_K)
        v = (x @ lp['wv'] + lp['bv']).reshape(B, S, N_HEAD, D_K)
        s = jnp.einsum('bqhd,bkhd->bhqk', q, k) / math.sqrt(D_K)
        s = s - m[:, None, None, :] * NEG_BIG
        a = jax.nn.softmax(s, axis=-1)
        o = jnp.einsum('bhqk,bkhd->bqhd', a, v).reshape(B, S, D_MODEL)
        o = o @ lp['wo'] + lp['bo']
        o = _ln_ref(o + residual, lp['ln1_g'], lp['ln1_b'])
        o = o * (1.0 - m)[:, :, None]
        residual = o
        y = jnp.maximum(_conv1d_ref(o, lp['w1'], lp['b1']), 0.0)
        z = _conv1d_ref(y, lp['w2'], lp['b2'])
        z = _ln_ref(z + residual, lp['ln2_g'], lp['ln2_b'])
        x = z * (1.0 - m)[:, :, None]
    return x


# ----------------------------- parameter init ---------------------------------
def init_params(key):
    kemb, klayers = jax.random.split(key)
    emb = 0.5 * jax.random.normal(kemb, (SRC_VOCAB, D_MODEL), jnp.float32)
    emb = emb.at[PAD].set(0.0)  # nn.Embedding(padding_idx=PAD)

    def lin(k, ci, co):
        return jax.random.normal(k, (ci, co), jnp.float32) / math.sqrt(ci)

    def bias(k, n):
        return 0.1 * jax.random.normal(k, (1, n), jnp.float32)

    k1, k2 = KERNEL_SIZE
    layers = []
    for lk in jax.random.split(klayers, N_LAYERS):
        ks = jax.random.split(lk, 16)
        layers.append(dict(
            wq=lin(ks[0], D_MODEL, N_HEAD * D_K), bq=bias(ks[1], N_HEAD * D_K),
            wk=lin(ks[2], D_MODEL, N_HEAD * D_K), bk=bias(ks[3], N_HEAD * D_K),
            wv=lin(ks[4], D_MODEL, N_HEAD * D_K), bv=bias(ks[5], N_HEAD * D_K),
            wo=lin(ks[6], N_HEAD * D_K, D_MODEL), bo=bias(ks[7], D_MODEL),
            ln1_g=1.0 + 0.1 * jax.random.normal(ks[8], (1, D_MODEL), jnp.float32),
            ln1_b=0.1 * jax.random.normal(ks[9], (1, D_MODEL), jnp.float32),
            w1=jax.random.normal(ks[10], (k1, D_MODEL, D_INNER), jnp.float32)
               / math.sqrt(k1 * D_MODEL),
            b1=bias(ks[11], D_INNER),
            w2=jax.random.normal(ks[12], (k2, D_INNER, D_MODEL), jnp.float32)
               / math.sqrt(k2 * D_INNER),
            b2=bias(ks[13], D_MODEL),
            ln2_g=1.0 + 0.1 * jax.random.normal(ks[14], (1, D_MODEL), jnp.float32),
            ln2_b=0.1 * jax.random.normal(ks[15], (1, D_MODEL), jnp.float32),
        ))
    return dict(emb=emb, layers=layers)


# ----------------------------- main --------------------------------------------
if __name__ == "__main__":
    key = jax.random.PRNGKey(0)
    pkey, skey = jax.random.split(key)

    params = init_params(pkey)
    pos_table = jnp.asarray(get_sinusoid_encoding_table(MAX_SEQ_LEN + 1, D_MODEL))

    src_seq = jax.random.randint(skey, (BATCH, SEQ), 1, SRC_VOCAB)
    src_seq = src_seq.at[0, 6:].set(PAD)   # padded tail, batch 0
    src_seq = src_seq.at[1, 4:].set(PAD)   # padded tail, batch 1
    mask = (src_seq == PAD)                # True == padded (masked_fill semantics)

    out = encoder_pallas(src_seq, mask, params, pos_table)
    out = jax.block_until_ready(out)

    ref = encoder_ref(src_seq, mask, params, pos_table)
    err = float(jnp.max(jnp.abs(out - ref)))
    # Tolerance reflects bf16 MXU inputs + EUP approx reciprocal vs the f32
    # reference (review: the tolerance must stay loose once bf16 is adopted).
    assert np.isfinite(err) and err < 1e-1, f"mismatch vs reference: {err}"

    # TODO(synk): masked_fill(-inf) is approximated with a finite -1e9; dropout is eval-mode identity.
    print("KERNEL_OK")
</pallas_src>

<mosaic_0001>
module attributes {stable_mosaic.version = 11 : i64} {
  func.func @encoder_kernel(%arg0: memref<16x32xf32, #tpu.memory_space<vmem>>, %arg1: memref<16x16xf32, #tpu.memory_space<vmem>>, %arg2: memref<16x1xf32, #tpu.memory_space<vmem>>, %arg3: memref<16x16xf32, #tpu.memory_space<vmem>>, %arg4: memref<16x16xf32, #tpu.memory_space<vmem>>, %arg5: memref<2x2x32x16xbf16, #tpu.memory_space<vmem>>, %arg6: memref<2x2x1x16xf32, #tpu.memory_space<vmem>>, %arg7: memref<2x2x32x16xbf16, #tpu.memory_space<vmem>>, %arg8: memref<2x2x1x16xf32, #tpu.memory_space<vmem>>, %arg9: memref<2x2x32x16xbf16, #tpu.memory_space<vmem>>, %arg10: memref<2x2x1x16xf32, #tpu.memory_space<vmem>>, %arg11: memref<2x2x16x32xbf16, #tpu.memory_space<vmem>>, %arg12: memref<2x1x32xf32, #tpu.memory_space<vmem>>, %arg13: memref<2x1x32xf32, #tpu.memory_space<vmem>>, %arg14: memref<2x1x32xf32, #tpu.memory_space<vmem>>, %arg15: memref<2x96x64xbf16, #tpu.memory_space<vmem>>, %arg16: memref<2x1x64xf32, #tpu.memory_space<vmem>>, %arg17: memref<2x64x32xbf16, #tpu.memory_space<vmem>>, %arg18: memref<2x1x32xf32, #tpu.memory_space<vmem>>, %arg19: memref<2x1x32xf32, #tpu.memory_space<vmem>>, %arg20: memref<2x1x32xf32, #tpu.memory_space<vmem>>, %arg21: memref<16x32xf32, #tpu.memory_space<vmem>>) attributes {dimension_semantics = [], scalar_prefetch = 0 : i64, scratch_operands = 0 : i64, tpu.core_type = #tpu.core_type<tc>} {
    %c0 = arith.constant 0 : index
    %c0_0 = arith.constant 0 : index
    %0 = vector.load %arg0[%c0, %c0_0] : memref<16x32xf32, #tpu.memory_space<vmem>>, vector<16x32xf32>
    %c0_1 = arith.constant 0 : index
    %c0_2 = arith.constant 0 : index
    %1 = vector.load %arg1[%c0_1, %c0_2] : memref<16x16xf32, #tpu.memory_space<vmem>>, vector<16x16xf32>
    %c0_3 = arith.constant 0 : index
    %c0_4 = arith.constant 0 : index
    %2 = vector.load %arg2[%c0_3, %c0_4] : memref<16x1xf32, #tpu.memory_space<vmem>>, vector<16x1xf32>
    %c0_5 = arith.constant 0 : index
    %c0_6 = arith.constant 0 : index
    %3 = vector.load %arg3[%c0_5, %c0_6] : memref<16x16xf32, #tpu.memory_space<vmem>>, vector<16x16xf32>
    %c0_7 = arith.constant 0 : index
    %c0_8 = arith.constant 0 : index
    %4 = vector.load %arg4[%c0_7, %c0_8] : memref<16x16xf32, #tpu.memory_space<vmem>>, vector<16x16xf32>
    %5 = arith.truncf %0 : vector<16x32xf32> to vector<16x32xbf16>
    %cst = arith.constant 0.000000e+00 : f32
    %6 = vector.broadcast %cst : f32 to vector<16x32xf32>
    %c0_9 = arith.constant 0 : index
    %c0_10 = arith.constant 0 : index
    %c0_11 = arith.constant 0 : index
    %c0_12 = arith.constant 0 : index
    %7 = vector.load %arg5[%c0_9, %c0_10, %c0_11, %c0_12] : memref<2x2x32x16xbf16, #tpu.memory_space<vmem>>, vector<1x1x32x16xbf16>
    %8 = vector.shape_cast %7 : vector<1x1x32x16xbf16> to vector<32x16xbf16>
    %cst_13 = arith.constant dense<0.000000e+00> : vector<16x16xf32>
    %9 = tpu.matmul %5, %8, %cst_13 {dimension_numbers = #tpu.dot_dimension_numbers<[1], [0], [0], [1], [0, 0, 1, 1], [], []>} : vector<16x32xbf16>, vector<32x16xbf16>, vector<16x16xf32> -> vector<16x16xf32>
    %c0_14 = arith.constant 0 : index
    %c0_15 = arith.constant 0 : index
    %c0_16 = arith.constant 0 : index
    %c0_17 = arith.constant 0 : index
    %10 = vector.load %arg6[%c0_14, %c0_15, %c0_16, %c0_17] : memref<2x2x1x16xf32, #tpu.memory_space<vmem>>, vector<1x1x1x16xf32>
    %11 = vector.shape_cast %10 : vector<1x1x1x16xf32> to vector<1x16xf32>
    %12 = vector.broadcast %11 : vector<1x16xf32> to vector<16x16xf32>
    %13 = arith.addf %9, %12 : vector<16x16xf32>
    %c0_18 = arith.constant 0 : index
    %c0_19 = arith.constant 0 : index
    %c0_20 = arith.constant 0 : index
    %c0_21 = arith.constant 0 : index
    %14 = vector.load %arg7[%c0_18, %c0_19, %c0_20, %c0_21] : memref<2x2x32x16xbf16, #tpu.memory_space<vmem>>, vector<1x1x32x16xbf16>
    %15 = vector.shape_cast %14 : vector<1x1x32x16xbf16> to vector<32x16xbf16>
    %cst_22 = arith.constant dense<0.000000e+00> : vector<16x16xf32>
    %16 = tpu.matmul %5, %15, %cst_22 {dimension_numbers = #tpu.dot_dimension_numbers<[1], [0], [0], [1], [0, 0, 1, 1], [], []>} : vector<16x32xbf16>, vector<32x16xbf16>, vector<16x16xf32> -> vector<16x16xf32>
    %c0_23 = arith.constant 0 : index
    %c0_24 = arith.constant 0 : index
    %c0_25 = arith.constant 0 : index
    %c0_26 = arith.constant 0 : index
    %17 = vector.load %arg8[%c0_23, %c0_24, %c0_25, %c0_26] : memref<2x2x1x16xf32, #tpu.memory_space<vmem>>, vector<1x1x1x16xf32>
    %18 = vector.shape_cast %17 : vector<1x1x1x16xf32> to vector<1x16xf32>
    %19 = vector.broadcast %18 : vector<1x16xf32> to vector<16x16xf32>
    %20 = arith.addf %16, %19 : vector<16x16xf32>
    %c0_27 = arith.constant 0 : index
    %c0_28 = arith.constant 0 : index
    %c0_29 = arith.constant 0 : index
    %c0_30 = arith.constant 0 : index
    %21 = vector.load %arg9[%c0_27, %c0_28, %c0_29, %c0_30] : memref<2x2x32x16xbf16, #tpu.memory_space<vmem>>, vector<1x1x32x16xbf16>
    %22 = vector.shape_cast %21 : vector<1x1x32x16xbf16> to vector<32x16xbf16>
    %cst_31 = arith.constant dense<0.000000e+00> : vector<16x16xf32>
    %23 = tpu.matmul %5, %22, %cst_31 {dimension_numbers = #tpu.dot_dimension_numbers<[1], [0], [0], [1], [0, 0, 1, 1], [], []>} : vector<16x32xbf16>, vector<32x16xbf16>, vector<16x16xf32> -> vector<16x16xf32>
    %c0_32 = arith.constant 0 : index
    %c0_33 = arith.constant 0 : index
    %c0_34 = arith.constant 0 : index
    %c0_35 = arith.constant 0 : index
    %24 = vector.load %arg10[%c0_32, %c0_33, %c0_34, %c0_35] : memref<2x2x1x16xf32, #tpu.memory_space<vmem>>, vector<1x1x1x16xf32>
    %25 = vector.shape_cast %24 : vector<1x1x1x16xf32> to vector<1x16xf32>
    %26 = vector.broadcast %25 : vector<1x16xf32> to vector<16x16xf32>
    %27 = arith.addf %23, %26 : vector<16x16xf32>
    %28 = arith.truncf %13 : vector<16x16xf32> to vector<16x16xbf16>
    %29 = arith.truncf %20 : vector<16x16xf32> to vector<16x16xbf16>
    %cst_36 = arith.constant dense<0.000000e+00> : vector<16x16xf32>
    %30 = tpu.matmul %28, %29, %cst_36 {dimension_numbers = #tpu.dot_dimension_numbers<[1], [1], [0], [0], [0, 0, 1, 0], [], []>} : vector<16x16xbf16>, vector<16x16xbf16>, vector<16x16xf32> -> vector<16x16xf32>
    %cst_37 = arith.constant 2.500000e-01 : f32
    %31 = vector.broadcast %cst_37 : f32 to vector<16x16xf32>
    %32 = arith.mulf %30, %31 : vector<16x16xf32>
    %33 = arith.addf %32, %1 : vector<16x16xf32>
    %cst_38 = arith.constant dense<0xFF800000> : vector<16xf32>
    %34 = vector.multi_reduction <maximumf>, %33, %cst_38 [1] : vector<16x16xf32> to vector<16xf32>
    %35 = vector.shape_cast %34 : vector<16xf32> to vector<16x1xf32>
    %36 = vector.broadcast %35 : vector<16x1xf32> to vector<16x16xf32>
    %37 = arith.subf %33, %36 : vector<16x16xf32>
    %38 = math.exp %37 : vector<16x16xf32>
    %cst_39 = arith.constant dense<0.000000e+00> : vector<16xf32>
    %39 = vector.multi_reduction <add>, %38, %cst_39 [1] : vector<16x16xf32> to vector<16xf32>
    %40 = vector.shape_cast %39 : vector<16xf32> to vector<16x1xf32>
    %41 = tpu.reciprocal %40 {approx = true} : vector<16x1xf32> -> vector<16x1xf32>
    %42 = vector.broadcast %41 : vector<16x1xf32> to vector<16x16xf32>
    %43 = arith.mulf %38, %42 : vector<16x16xf32>
    %44 = arith.truncf %43 : vector<16x16xf32> to vector<16x16xbf16>
    %45 = arith.truncf %27 : vector<16x16xf32> to vector<16x16xbf16>
    %cst_40 = arith.constant dense<0.000000e+00> : vector<16x16xf32>
    %46 = tpu.matmul %44, %45, %cst_40 {dimension_numbers = #tpu.dot_dimension_numbers<[1], [0], [0], [1], [0, 0, 1, 1], [], []>} : vector<16x16xbf16>, vector<16x16xbf16>, vector<16x16xf32> -> vector<16x16xf32>
    %47 = arith.truncf %46 : vector<16x16xf32> to vector<16x16xbf16>
    %c0_41 = arith.constant 0 : index
    %c0_42 = arith.constant 0 : index
    %c0_43 = arith.constant 0 : index
    %c0_44 = arith.constant 0 : index
    %48 = vector.load %arg11[%c0_41, %c0_42, %c0_43, %c0_44] : memref<2x2x16x32xbf16, #tpu.memory_space<vmem>>, vector<1x1x16x32xbf16>
    %49 = vector.shape_cast %48 : vector<1x1x16x32xbf16> to vector<16x32xbf16>
    %cst_45 = arith.constant dense<0.000000e+00> : vector<16x32xf32>
    %50 = tpu.matmul %47, %49, %cst_45 {dimension_numbers = #tpu.dot_dimension_numbers<[1], [0], [0], [1], [0, 0, 1, 1], [], []>} : vector<16x16xbf16>, vector<16x32xbf16>, vector<16x32xf32> -> vector<16x32xf32>
    %51 = arith.addf %6, %50 : vector<16x32xf32>
    %c0_46 = arith.constant 0 : index
    %c1 = arith.constant 1 : index
    %c0_47 = arith.constant 0 : index
    %c0_48 = arith.constant 0 : index
    %52 = vector.load %arg5[%c0_46, %c1, %c0_47, %c0_48] : memref<2x2x32x16xbf16, #tpu.memory_space<vmem>>, vector<1x1x32x16xbf16>
    %53 = vector.shape_cast %52 : vector<1x1x32x16xbf16> to vector<32x16xbf16>
    %cst_49 = arith.constant dense<0.000000e+00> : vector<16x16xf32>
    %54 = tpu.matmul %5, %53, %cst_49 {dimension_numbers = #tpu.dot_dimension_numbers<[1], [0], [0], [1], [0, 0, 1, 1], [], []>} : vector<16x32xbf16>, vector<32x16xbf16>, vector<16x16xf32> -> vector<16x16xf32>
    %c0_50 = arith.constant 0 : index
    %c1_51 = arith.constant 1 : index
    %c0_52 = arith.constant 0 : index
    %c0_53 = arith.constant 0 : index
    %55 = vector.load %arg6[%c0_50, %c1_51, %c0_52, %c0_53] : memref<2x2x1x16xf32, #tpu.memory_space<vmem>>, vector<1x1x1x16xf32>
    %56 = vector.shape_cast %55 : vector<1x1x1x16xf32> to vector<1x16xf32>
    %57 = vector.broadcast %56 : vector<1x16xf32> to vector<16x16xf32>
    %58 = arith.addf %54, %57 : vector<16x16xf32>
    %c0_54 = arith.constant 0 : index
    %c1_55 = arith.constant 1 : index
    %c0_56 = arith.constant 0 : index
    %c0_57 = arith.constant 0 : index
    %59 = vector.load %arg7[%c0_54, %c1_55, %c0_56, %c0_57] : memref<2x2x32x16xbf16, #tpu.memory_space<vmem>>, vector<1x1x32x16xbf16>
    %60 = vector.shape_cast %59 : vector<1x1x32x16xbf16> to vector<32x16xbf16>
    %cst_58 = arith.constant dense<0.000000e+00> : vector<16x16xf32>
    %61 = tpu.matmul %5, %60, %cst_58 {dimension_numbers = #tpu.dot_dimension_numbers<[1], [0], [0], [1], [0, 0, 1, 1], [], []>} : vector<16x32xbf16>, vector<32x16xbf16>, vector<16x16xf32> -> vector<16x16xf32>
    %c0_59 = arith.constant 0 : index
    %c1_60 = arith.constant 1 : index
    %c0_61 = arith.constant 0 : index
    %c0_62 = arith.constant 0 : index
    %62 = vector.load %arg8[%c0_59, %c1_60, %c0_61, %c0_62] : memref<2x2x1x16xf32, #tpu.memory_space<vmem>>, vector<1x1x1x16xf32>
    %63 = vector.shape_cast %62 : vector<1x1x1x16xf32> to vector<1x16xf32>
    %64 = vector.broadcast %63 : vector<1x16xf32> to vector<16x16xf32>
    %65 = arith.addf %61, %64 : vector<16x16xf32>
    %c0_63 = arith.constant 0 : index
    %c1_64 = arith.constant 1 : index
    %c0_65 = arith.constant 0 : index
    %c0_66 = arith.constant 0 : index
    %66 = vector.load %arg9[%c0_63, %c1_64, %c0_65, %c0_66] : memref<2x2x32x16xbf16, #tpu.memory_space<vmem>>, vector<1x1x32x16xbf16>
    %67 = vector.shape_cast %66 : vector<1x1x32x16xbf16> to vector<32x16xbf16>
    %cst_67 = arith.constant dense<0.000000e+00> : vector<16x16xf32>
    %68 = tpu.matmul %5, %67, %cst_67 {dimension_numbers = #tpu.dot_dimension_numbers<[1], [0], [0], [1], [0, 0, 1, 1], [], []>} : vector<16x32xbf16>, vector<32x16xbf16>, vector<16x16xf32> -> vector<16x16xf32>
    %c0_68 = arith.constant 0 : index
    %c1_69 = arith.constant 1 : index
    %c0_70 = arith.constant 0 : index
    %c0_71 = arith.constant 0 : index
    %69 = vector.load %arg10[%c0_68, %c1_69, %c0_70, %c0_71] : memref<2x2x1x16xf32, #tpu.memory_space<vmem>>, vector<1x1x1x16xf32>
    %70 = vector.shape_cast %69 : vector<1x1x1x16xf32> to vector<1x16xf32>
    %71 = vector.broadcast %70 : vector<1x16xf32> to vector<16x16xf32>
    %72 = arith.addf %68, %71 : vector<16x16xf32>
    %73 = arith.truncf %58 : vector<16x16xf32> to vector<16x16xbf16>
    %74 = arith.truncf %65 : vector<16x16xf32> to vector<16x16xbf16>
    %cst_72 = arith.constant dense<0.000000e+00> : vector<16x16xf32>
    %75 = tpu.matmul %73, %74, %cst_72 {dimension_numbers = #tpu.dot_dimension_numbers<[1], [1], [0], [0], [0, 0, 1, 0], [], []>} : vector<16x16xbf16>, vector<16x16xbf16>, vector<16x16xf32> -> vector<16x16xf32>
    %cst_73 = arith.constant 2.500000e-01 : f32
    %76 = vector.broadcast %cst_73 : f32 to vector<16x16xf32>
    %77 = arith.mulf %75, %76 : vector<16x16xf32>
    %78 = arith.addf %77, %1 : vector<16x16xf32>
    %cst_74 = arith.constant dense<0xFF800000> : vector<16xf32>
    %79 = vector.multi_reduction <maximumf>, %78, %cst_74 [1] : vector<16x16xf32> to vector<16xf32>
    %80 = vector.shape_cast %79 : vector<16xf32> to vector<16x1xf32>
    %81 = vector.broadcast %80 : vector<16x1xf32> to vector<16x16xf32>
    %82 = arith.subf %78, %81 : vector<16x16xf32>
    %83 = math.exp %82 : vector<16x16xf32>
    %cst_75 = arith.constant dense<0.000000e+00> : vector<16xf32>
    %84 = vector.multi_reduction <add>, %83, %cst_75 [1] : vector<16x16xf32> to vector<16xf32>
    %85 = vector.shape_cast %84 : vector<16xf32> to vector<16x1xf32>
    %86 = tpu.reciprocal %85 {approx = true} : vector<16x1xf32> -> vector<16x1xf32>
    %87 = vector.broadcast %86 : vector<16x1xf32> to vector<16x16xf32>
    %88 = arith.mulf %83, %87 : vector<16x16xf32>
    %89 = arith.truncf %88 : vector<16x16xf32> to vector<16x16xbf16>
    %90 = arith.truncf %72 : vector<16x16xf32> to vector<16x16xbf16>
    %cst_76 = arith.constant dense<0.000000e+00> : vector<16x16xf32>
    %91 = tpu.matmul %89, %90, %cst_76 {dimension_numbers = #tpu.dot_dimension_numbers<[1], [0], [0], [1], [0, 0, 1, 1], [], []>} : vector<16x16xbf16>, vector<16x16xbf16>, vector<16x16xf32> -> vector<16x16xf32>
    %92 = arith.truncf %91 : vector<16x16xf32> to vector<16x16xbf16>
    %c0_77 = arith.constant 0 : index
    %c1_78 = arith.constant 1 : index
    %c0_79 = arith.constant 0 : index
    %c0_80 = arith.constant 0 : index
    %93 = vector.load %arg11[%c0_77, %c1_78, %c0_79, %c0_80] : memref<2x2x16x32xbf16, #tpu.memory_space<vmem>>, vector<1x1x16x32xbf16>
    %94 = vector.shape_cast %93 : vector<1x1x16x32xbf16> to vector<16x32xbf16>
    %cst_81 = arith.constant dense<0.000000e+00> : vector<16x32xf32>
    %95 = tpu.matmul %92, %94, %cst_81 {dimension_numbers = #tpu.dot_dimension_numbers<[1], [0], [0], [1], [0, 0, 1, 1], [], []>} : vector<16x16xbf16>, vector<16x32xbf16>, vector<16x32xf32> -> vector<16x32xf32>
    %96 = arith.addf %51, %95 : vector<16x32xf32>
    %c0_82 = arith.constant 0 : index
    %c0_83 = arith.constant 0 : index
    %c0_84 = arith.constant 0 : index
    %97 = vector.load %arg12[%c0_82, %c0_83, %c0_84] : memref<2x1x32xf32, #tpu.memory_space<vmem>>, vector<1x1x32xf32>
    %98 = vector.shape_cast %97 : vector<1x1x32xf32> to vector<1x32xf32>
    %99 = vector.broadcast %98 : vector<1x32xf32> to vector<16x32xf32>
    %100 = arith.addf %96, %99 : vector<16x32xf32>
    %101 = arith.addf %100, %0 : vector<16x32xf32>
    %c0_85 = arith.constant 0 : index
    %c0_86 = arith.constant 0 : index
    %c0_87 = arith.constant 0 : index
    %102 = vector.load %arg13[%c0_85, %c0_86, %c0_87] : memref<2x1x32xf32, #tpu.memory_space<vmem>>, vector<1x1x32xf32>
    %103 = vector.shape_cast %102 : vector<1x1x32xf32> to vector<1x32xf32>
    %c0_88 = arith.constant 0 : index
    %c0_89 = arith.constant 0 : index
    %c0_90 = arith.constant 0 : index
    %104 = vector.load %arg14[%c0_88, %c0_89, %c0_90] : memref<2x1x32xf32, #tpu.memory_space<vmem>>, vector<1x1x32xf32>
    %105 = vector.shape_cast %104 : vector<1x1x32xf32> to vector<1x32xf32>
    %cst_91 = arith.constant dense<0.000000e+00> : vector<16xf32>
    %106 = vector.multi_reduction <add>, %101, %cst_91 [1] : vector<16x32xf32> to vector<16xf32>
    %107 = vector.shape_cast %106 : vector<16xf32> to vector<16x1xf32>
    %cst_92 = arith.constant 3.200000e+01 : f32
    %108 = vector.broadcast %cst_92 : f32 to vector<16x1xf32>
    %109 = arith.divf %107, %108 : vector<16x1xf32>
    %110 = vector.broadcast %109 : vector<16x1xf32> to vector<16x32xf32>
    %111 = arith.subf %101, %110 : vector<16x32xf32>
    %112 = arith.mulf %111, %111 : vector<16x32xf32>
    %cst_93 = arith.constant dense<0.000000e+00> : vector<16xf32>
    %113 = vector.multi_reduction <add>, %112, %cst_93 [1] : vector<16x32xf32> to vector<16xf32>
    %114 = vector.shape_cast %113 : vector<16xf32> to vector<16x1xf32>
    %cst_94 = arith.constant 3.200000e+01 : f32
    %115 = vector.broadcast %cst_94 : f32 to vector<16x1xf32>
    %116 = arith.divf %114, %115 : vector<16x1xf32>
    %117 = vector.broadcast %109 : vector<16x1xf32> to vector<16x32xf32>
    %118 = arith.subf %101, %117 : vector<16x32xf32>
    %cst_95 = arith.constant 9.99999974E-6 : f32
    %119 = vector.broadcast %cst_95 : f32 to vector<16x1xf32>
    %120 = arith.addf %116, %119 : vector<16x1xf32>
    %121 = math.rsqrt %120 : vector<16x1xf32>
    %122 = vector.broadcast %121 : vector<16x1xf32> to vector<16x32xf32>
    %123 = arith.mulf %118, %122 : vector<16x32xf32>
    %124 = vector.broadcast %103 : vector<1x32xf32> to vector<16x32xf32>
    %125 = arith.mulf %123, %124 : vector<16x32xf32>
    %126 = vector.broadcast %105 : vector<1x32xf32> to vector<16x32xf32>
    %127 = arith.addf %125, %126 : vector<16x32xf32>
    %128 = vector.broadcast %2 : vector<16x1xf32> to vector<16x32xf32>
    %129 = arith.mulf %127, %128 : vector<16x32xf32>
    %cst_96 = arith.constant dense<0.000000e+00> : vector<16x32xf32>
    %130 = tpu.matmul %3, %129, %cst_96 {dimension_numbers = #tpu.dot_dimension_numbers<[1], [0], [0], [1], [0, 0, 1, 1], [], []>} : vector<16x16xf32>, vector<16x32xf32>, vector<16x32xf32> -> vector<16x32xf32>
    %cst_97 = arith.constant dense<0.000000e+00> : vector<16x32xf32>
    %131 = tpu.matmul %4, %129, %cst_97 {dimension_numbers = #tpu.dot_dimension_numbers<[1], [0], [0], [1], [0, 0, 1, 1], [], []>} : vector<16x16xf32>, vector<16x32xf32>, vector<16x32xf32> -> vector<16x32xf32>
    %132 = tpu.concatenate %130, %129, %131 in 1 : vector<16x32xf32>, vector<16x32xf32>, vector<16x32xf32> -> vector<16x96xf32>
    %133 = arith.truncf %132 : vector<16x96xf32> to vector<16x96xbf16>
    %c0_98 = arith.constant 0 : index
    %c0_99 = arith.constant 0 : index
    %c0_100 = arith.constant 0 : index
    %134 = vector.load %arg15[%c0_98, %c0_99, %c0_100] : memref<2x96x64xbf16, #tpu.memory_space<vmem>>, vector<1x96x64xbf16>
    %135 = vector.shape_cast %134 : vector<1x96x64xbf16> to vector<96x64xbf16>
    %cst_101 = arith.constant dense<0.000000e+00> : vector<16x64xf32>
    %136 = tpu.matmul %133, %135, %cst_101 {dimension_numbers = #tpu.dot_dimension_numbers<[1], [0], [0], [1], [0, 0, 1, 1], [], []>} : vector<16x96xbf16>, vector<96x64xbf16>, vector<16x64xf32> -> vector<16x64xf32>
    %c0_102 = arith.constant 0 : index
    %c0_103 = arith.constant 0 : index
    %c0_104 = arith.constant 0 : index
    %137 = vector.load %arg16[%c0_102, %c0_103, %c0_104] : memref<2x1x64xf32, #tpu.memory_space<vmem>>, vector<1x1x64xf32>
    %138 = vector.shape_cast %137 : vector<1x1x64xf32> to vector<1x64xf32>
    %139 = vector.broadcast %138 : vector<1x64xf32> to vector<16x64xf32>
    %140 = arith.addf %136, %139 : vector<16x64xf32>
    %cst_105 = arith.constant 0.000000e+00 : f32
    %141 = vector.broadcast %cst_105 : f32 to vector<16x64xf32>
    %142 = arith.maximumf %140, %141 : vector<16x64xf32>
    %143 = arith.truncf %142 : vector<16x64xf32> to vector<16x64xbf16>
    %c0_106 = arith.constant 0 : index
    %c0_107 = arith.constant 0 : index
    %c0_108 = arith.constant 0 : index
    %144 = vector.load %arg17[%c0_106, %c0_107, %c0_108] : memref<2x64x32xbf16, #tpu.memory_space<vmem>>, vector<1x64x32xbf16>
    %145 = vector.shape_cast %144 : vector<1x64x32xbf16> to vector<64x32xbf16>
    %cst_109 = arith.constant dense<0.000000e+00> : vector<16x32xf32>
    %146 = tpu.matmul %143, %145, %cst_109 {dimension_numbers = #tpu.dot_dimension_numbers<[1], [0], [0], [1], [0, 0, 1, 1], [], []>} : vector<16x64xbf16>, vector<64x32xbf16>, vector<16x32xf32> -> vector<16x32xf32>
    %c0_110 = arith.constant 0 : index
    %c0_111 = arith.constant 0 : index
    %c0_112 = arith.constant 0 : index
    %147 = vector.load %arg18[%c0_110, %c0_111, %c0_112] : memref<2x1x32xf32, #tpu.memory_space<vmem>>, vector<1x1x32xf32>
    %148 = vector.shape_cast %147 : vector<1x1x32xf32> to vector<1x32xf32>
    %149 = vector.broadcast %148 : vector<1x32xf32> to vector<16x32xf32>
    %150 = arith.addf %146, %149 : vector<16x32xf32>
    %151 = arith.addf %150, %129 : vector<16x32xf32>
    %c0_113 = arith.constant 0 : index
    %c0_114 = arith.constant 0 : index
    %c0_115 = arith.constant 0 : index
    %152 = vector.load %arg19[%c0_113, %c0_114, %c0_115] : memref<2x1x32xf32, #tpu.memory_space<vmem>>, vector<1x1x32xf32>
    %153 = vector.shape_cast %152 : vector<1x1x32xf32> to vector<1x32xf32>
    %c0_116 = arith.constant 0 : index
    %c0_117 = arith.constant 0 : index
    %c0_118 = arith.constant 0 : index
    %154 = vector.load %arg20[%c0_116, %c0_117, %c0_118] : memref<2x1x32xf32, #tpu.memory_space<vmem>>, vector<1x1x32xf32>
    %155 = vector.shape_cast %154 : vector<1x1x32xf32> to vector<1x32xf32>
    %cst_119 = arith.constant dense<0.000000e+00> : vector<16xf32>
    %156 = vector.multi_reduction <add>, %151, %cst_119 [1] : vector<16x32xf32> to vector<16xf32>
    %157 = vector.shape_cast %156 : vector<16xf32> to vector<16x1xf32>
    %cst_120 = arith.constant 3.200000e+01 : f32
    %158 = vector.broadcast %cst_120 : f32 to vector<16x1xf32>
    %159 = arith.divf %157, %158 : vector<16x1xf32>
    %160 = vector.broadcast %159 : vector<16x1xf32> to vector<16x32xf32>
    %161 = arith.subf %151, %160 : vector<16x32xf32>
    %162 = arith.mulf %161, %161 : vector<16x32xf32>
    %cst_121 = arith.constant dense<0.000000e+00> : vector<16xf32>
    %163 = vector.multi_reduction <add>, %162, %cst_121 [1] : vector<16x32xf32> to vector<16xf32>
    %164 = vector.shape_cast %163 : vector<16xf32> to vector<16x1xf32>
    %cst_122 = arith.constant 3.200000e+01 : f32
    %165 = vector.broadcast %cst_122 : f32 to vector<16x1xf32>
    %166 = arith.divf %164, %165 : vector<16x1xf32>
    %167 = vector.broadcast %159 : vector<16x1xf32> to vector<16x32xf32>
    %168 = arith.subf %151, %167 : vector<16x32xf32>
    %cst_123 = arith.constant 9.99999974E-6 : f32
    %169 = vector.broadcast %cst_123 : f32 to vector<16x1xf32>
    %170 = arith.addf %166, %169 : vector<16x1xf32>
    %171 = math.rsqrt %170 : vector<16x1xf32>
    %172 = vector.broadcast %171 : vector<16x1xf32> to vector<16x32xf32>
    %173 = arith.mulf %168, %172 : vector<16x32xf32>
    %174 = vector.broadcast %153 : vector<1x32xf32> to vector<16x32xf32>
    %175 = arith.mulf %173, %174 : vector<16x32xf32>
    %176 = vector.broadcast %155 : vector<1x32xf32> to vector<16x32xf32>
    %177 = arith.addf %175, %176 : vector<16x32xf32>
    %178 = vector.broadcast %2 : vector<16x1xf32> to vector<16x32xf32>
    %179 = arith.mulf %177, %178 : vector<16x32xf32>
    %180 = arith.truncf %179 : vector<16x32xf32> to vector<16x32xbf16>
    %cst_124 = arith.constant 0.000000e+00 : f32
    %181 = vector.broadcast %cst_124 : f32 to vector<16x32xf32>
    %c1_125 = arith.constant 1 : index
    %c0_126 = arith.constant 0 : index
    %c0_127 = arith.constant 0 : index
    %c0_128 = arith.constant 0 : index
    %182 = vector.load %arg5[%c1_125, %c0_126, %c0_127, %c0_128] : memref<2x2x32x16xbf16, #tpu.memory_space<vmem>>, vector<1x1x32x16xbf16>
    %183 = vector.shape_cast %182 : vector<1x1x32x16xbf16> to vector<32x16xbf16>
    %cst_129 = arith.constant dense<0.000000e+00> : vector<16x16xf32>
    %184 = tpu.matmul %180, %183, %cst_129 {dimension_numbers = #tpu.dot_dimension_numbers<[1], [0], [0], [1], [0, 0, 1, 1], [], []>} : vector<16x32xbf16>, vector<32x16xbf16>, vector<16x16xf32> -> vector<16x16xf32>
    %c1_130 = arith.constant 1 : index
    %c0_131 = arith.constant 0 : index
    %c0_132 = arith.constant 0 : index
    %c0_133 = arith.constant 0 : index
    %185 = vector.load %arg6[%c1_130, %c0_131, %c0_132, %c0_133] : memref<2x2x1x16xf32, #tpu.memory_space<vmem>>, vector<1x1x1x16xf32>
    %186 = vector.shape_cast %185 : vector<1x1x1x16xf32> to vector<1x16xf32>
    %187 = vector.broadcast %186 : vector<1x16xf32> to vector<16x16xf32>
    %188 = arith.addf %184, %187 : vector<16x16xf32>
    %c1_134 = arith.constant 1 : index
    %c0_135 = arith.constant 0 : index
    %c0_136 = arith.constant 0 : index
    %c0_137 = arith.constant 0 : index
    %189 = vector.load %arg7[%c1_134, %c0_135, %c0_136, %c0_137] : memref<2x2x32x16xbf16, #tpu.memory_space<vmem>>, vector<1x1x32x16xbf16>
    %190 = vector.shape_cast %189 : vector<1x1x32x16xbf16> to vector<32x16xbf16>
    %cst_138 = arith.constant dense<0.000000e+00> : vector<16x16xf32>
    %191 = tpu.matmul %180, %190, %cst_138 {dimension_numbers = #tpu.dot_dimension_numbers<[1], [0], [0], [1], [0, 0, 1, 1], [], []>} : vector<16x32xbf16>, vector<32x16xbf16>, vector<16x16xf32> -> vector<16x16xf32>
    %c1_139 = arith.constant 1 : index
    %c0_140 = arith.constant 0 : index
    %c0_141 = arith.constant 0 : index
    %c0_142 = arith.constant 0 : index
    %192 = vector.load %arg8[%c1_139, %c0_140, %c0_141, %c0_142] : memref<2x2x1x16xf32, #tpu.memory_space<vmem>>, vector<1x1x1x16xf32>
    %193 = vector.shape_cast %192 : vector<1x1x1x16xf32> to vector<1x16xf32>
    %194 = vector.broadcast %193 : vector<1x16xf32> to vector<16x16xf32>
    %195 = arith.addf %191, %194 : vector<16x16xf32>
    %c1_143 = arith.constant 1 : index
    %c0_144 = arith.constant 0 : index
    %c0_145 = arith.constant 0 : index
    %c0_146 = arith.constant 0 : index
    %196 = vector.load %arg9[%c1_143, %c0_144, %c0_145, %c0_146] : memref<2x2x32x16xbf16, #tpu.memory_space<vmem>>, vector<1x1x32x16xbf16>
    %197 = vector.shape_cast %196 : vector<1x1x32x16xbf16> to vector<32x16xbf16>
    %cst_147 = arith.constant dense<0.000000e+00> : vector<16x16xf32>
    %198 = tpu.matmul %180, %197, %cst_147 {dimension_numbers = #tpu.dot_dimension_numbers<[1], [0], [0], [1], [0, 0, 1, 1], [], []>} : vector<16x32xbf16>, vector<32x16xbf16>, vector<16x16xf32> -> vector<16x16xf32>
    %c1_148 = arith.constant 1 : index
    %c0_149 = arith.constant 0 : index
    %c0_150 = arith.constant 0 : index
    %c0_151 = arith.constant 0 : index
    %199 = vector.load %arg10[%c1_148, %c0_149, %c0_150, %c0_151] : memref<2x2x1x16xf32, #tpu.memory_space<vmem>>, vector<1x1x1x16xf32>
    %200 = vector.shape_cast %199 : vector<1x1x1x16xf32> to vector<1x16xf32>
    %201 = vector.broadcast %200 : vector<1x16xf32> to vector<16x16xf32>
    %202 = arith.addf %198, %201 : vector<16x16xf32>
    %203 = arith.truncf %188 : vector<16x16xf32> to vector<16x16xbf16>
    %204 = arith.truncf %195 : vector<16x16xf32> to vector<16x16xbf16>
    %cst_152 = arith.constant dense<0.000000e+00> : vector<16x16xf32>
    %205 = tpu.matmul %203, %204, %cst_152 {dimension_numbers = #tpu.dot_dimension_numbers<[1], [1], [0], [0], [0, 0, 1, 0], [], []>} : vector<16x16xbf16>, vector<16x16xbf16>, vector<16x16xf32> -> vector<16x16xf32>
    %cst_153 = arith.constant 2.500000e-01 : f32
    %206 = vector.broadcast %cst_153 : f32 to vector<16x16xf32>
    %207 = arith.mulf %205, %206 : vector<16x16xf32>
    %208 = arith.addf %207, %1 : vector<16x16xf32>
    %cst_154 = arith.constant dense<0xFF800000> : vector<16xf32>
    %209 = vector.multi_reduction <maximumf>, %208, %cst_154 [1] : vector<16x16xf32> to vector<16xf32>
    %210 = vector.shape_cast %209 : vector<16xf32> to vector<16x1xf32>
    %211 = vector.broadcast %210 : vector<16x1xf32> to vector<16x16xf32>
    %212 = arith.subf %208, %211 : vector<16x16xf32>
    %213 = math.exp %212 : vector<16x16xf32>
    %cst_155 = arith.constant dense<0.000000e+00> : vector<16xf32>
    %214 = vector.multi_reduction <add>, %213, %cst_155 [1] : vector<16x16xf32> to vector<16xf32>
    %215 = vector.shape_cast %214 : vector<16xf32> to vector<16x1xf32>
    %216 = tpu.reciprocal %215 {approx = true} : vector<16x1xf32> -> vector<16x1xf32>
    %217 = vector.broadcast %216 : vector<16x1xf32> to vector<16x16xf32>
    %218 = arith.mulf %213, %217 : vector<16x16xf32>
    %219 = arith.truncf %218 : vector<16x16xf32> to vector<16x16xbf16>
    %220 = arith.truncf %202 : vector<16x16xf32> to vector<16x16xbf16>
    %cst_156 = arith.constant dense<0.000000e+00> : vector<16x16xf32>
    %221 = tpu.matmul %219, %220, %cst_156 {dimension_numbers = #tpu.dot_dimension_numbers<[1], [0], [0], [1], [0, 0, 1, 1], [], []>} : vector<16x16xbf16>, vector<16x16xbf16>, vector<16x16xf32> -> vector<16x16xf32>
    %222 = arith.truncf %221 : vector<16x16xf32> to vector<16x16xbf16>
    %c1_157 = arith.constant 1 : index
    %c0_158 = arith.constant 0 : index
    %c0_159 = arith.constant 0 : index
    %c0_160 = arith.constant 0 : index
    %223 = vector.load %arg11[%c1_157, %c0_158, %c0_159, %c0_160] : memref<2x2x16x32xbf16, #tpu.memory_space<vmem>>, vector<1x1x16x32xbf16>
    %224 = vector.shape_cast %223 : vector<1x1x16x32xbf16> to vector<16x32xbf16>
    %cst_161 = arith.constant dense<0.000000e+00> : vector<16x32xf32>
    %225 = tpu.matmul %222, %224, %cst_161 {dimension_numbers = #tpu.dot_dimension_numbers<[1], [0], [0], [1], [0, 0, 1, 1], [], []>} : vector<16x16xbf16>, vector<16x32xbf16>, vector<16x32xf32> -> vector<16x32xf32>
    %226 = arith.addf %181, %225 : vector<16x32xf32>
    %c1_162 = arith.constant 1 : index
    %c1_163 = arith.constant 1 : index
    %c0_164 = arith.constant 0 : index
    %c0_165 = arith.constant 0 : index
    %227 = vector.load %arg5[%c1_162, %c1_163, %c0_164, %c0_165] : memref<2x2x32x16xbf16, #tpu.memory_space<vmem>>, vector<1x1x32x16xbf16>
    %228 = vector.shape_cast %227 : vector<1x1x32x16xbf16> to vector<32x16xbf16>
    %cst_166 = arith.constant dense<0.000000e+00> : vector<16x16xf32>
    %229 = tpu.matmul %180, %228, %cst_166 {dimension_numbers = #tpu.dot_dimension_numbers<[1], [0], [0], [1], [0, 0, 1, 1], [], []>} : vector<16x32xbf16>, vector<32x16xbf16>, vector<16x16xf32> -> vector<16x16xf32>
    %c1_167 = arith.constant 1 : index
    %c1_168 = arith.constant 1 : index
    %c0_169 = arith.constant 0 : index
    %c0_170 = arith.constant 0 : index
    %230 = vector.load %arg6[%c1_167, %c1_168, %c0_169, %c0_170] : memref<2x2x1x16xf32, #tpu.memory_space<vmem>>, vector<1x1x1x16xf32>
    %231 = vector.shape_cast %230 : vector<1x1x1x16xf32> to vector<1x16xf32>
    %232 = vector.broadcast %231 : vector<1x16xf32> to vector<16x16xf32>
    %233 = arith.addf %229, %232 : vector<16x16xf32>
    %c1_171 = arith.constant 1 : index
    %c1_172 = arith.constant 1 : index
    %c0_173 = arith.constant 0 : index
    %c0_174 = arith.constant 0 : index
    %234 = vector.load %arg7[%c1_171, %c1_172, %c0_173, %c0_174] : memref<2x2x32x16xbf16, #tpu.memory_space<vmem>>, vector<1x1x32x16xbf16>
    %235 = vector.shape_cast %234 : vector<1x1x32x16xbf16> to vector<32x16xbf16>
    %cst_175 = arith.constant dense<0.000000e+00> : vector<16x16xf32>
    %236 = tpu.matmul %180, %235, %cst_175 {dimension_numbers = #tpu.dot_dimension_numbers<[1], [0], [0], [1], [0, 0, 1, 1], [], []>} : vector<16x32xbf16>, vector<32x16xbf16>, vector<16x16xf32> -> vector<16x16xf32>
    %c1_176 = arith.constant 1 : index
    %c1_177 = arith.constant 1 : index
    %c0_178 = arith.constant 0 : index
    %c0_179 = arith.constant 0 : index
    %237 = vector.load %arg8[%c1_176, %c1_177, %c0_178, %c0_179] : memref<2x2x1x16xf32, #tpu.memory_space<vmem>>, vector<1x1x1x16xf32>
    %238 = vector.shape_cast %237 : vector<1x1x1x16xf32> to vector<1x16xf32>
    %239 = vector.broadcast %238 : vector<1x16xf32> to vector<16x16xf32>
    %240 = arith.addf %236, %239 : vector<16x16xf32>
    %c1_180 = arith.constant 1 : index
    %c1_181 = arith.constant 1 : index
    %c0_182 = arith.constant 0 : index
    %c0_183 = arith.constant 0 : index
    %241 = vector.load %arg9[%c1_180, %c1_181, %c0_182, %c0_183] : memref<2x2x32x16xbf16, #tpu.memory_space<vmem>>, vector<1x1x32x16xbf16>
    %242 = vector.shape_cast %241 : vector<1x1x32x16xbf16> to vector<32x16xbf16>
    %cst_184 = arith.constant dense<0.000000e+00> : vector<16x16xf32>
    %243 = tpu.matmul %180, %242, %cst_184 {dimension_numbers = #tpu.dot_dimension_numbers<[1], [0], [0], [1], [0, 0, 1, 1], [], []>} : vector<16x32xbf16>, vector<32x16xbf16>, vector<16x16xf32> -> vector<16x16xf32>
    %c1_185 = arith.constant 1 : index
    %c1_186 = arith.constant 1 : index
    %c0_187 = arith.constant 0 : index
    %c0_188 = arith.constant 0 : index
    %244 = vector.load %arg10[%c1_185, %c1_186, %c0_187, %c0_188] : memref<2x2x1x16xf32, #tpu.memory_space<vmem>>, vector<1x1x1x16xf32>
    %245 = vector.shape_cast %244 : vector<1x1x1x16xf32> to vector<1x16xf32>
    %246 = vector.broadcast %245 : vector<1x16xf32> to vector<16x16xf32>
    %247 = arith.addf %243, %246 : vector<16x16xf32>
    %248 = arith.truncf %233 : vector<16x16xf32> to vector<16x16xbf16>
    %249 = arith.truncf %240 : vector<16x16xf32> to vector<16x16xbf16>
    %cst_189 = arith.constant dense<0.000000e+00> : vector<16x16xf32>
    %250 = tpu.matmul %248, %249, %cst_189 {dimension_numbers = #tpu.dot_dimension_numbers<[1], [1], [0], [0], [0, 0, 1, 0], [], []>} : vector<16x16xbf16>, vector<16x16xbf16>, vector<16x16xf32> -> vector<16x16xf32>
    %cst_190 = arith.constant 2.500000e-01 : f32
    %251 = vector.broadcast %cst_190 : f32 to vector<16x16xf32>
    %252 = arith.mulf %250, %251 : vector<16x16xf32>
    %253 = arith.addf %252, %1 : vector<16x16xf32>
    %cst_191 = arith.constant dense<0xFF800000> : vector<16xf32>
    %254 = vector.multi_reduction <maximumf>, %253, %cst_191 [1] : vector<16x16xf32> to vector<16xf32>
    %255 = vector.shape_cast %254 : vector<16xf32> to vector<16x1xf32>
    %256 = vector.broadcast %255 : vector<16x1xf32> to vector<16x16xf32>
    %257 = arith.subf %253, %256 : vector<16x16xf32>
    %258 = math.exp %257 : vector<16x16xf32>
    %cst_192 = arith.constant dense<0.000000e+00> : vector<16xf32>
    %259 = vector.multi_reduction <add>, %258, %cst_192 [1] : vector<16x16xf32> to vector<16xf32>
    %260 = vector.shape_cast %259 : vector<16xf32> to vector<16x1xf32>
    %261 = tpu.reciprocal %260 {approx = true} : vector<16x1xf32> -> vector<16x1xf32>
    %262 = vector.broadcast %261 : vector<16x1xf32> to vector<16x16xf32>
    %263 = arith.mulf %258, %262 : vector<16x16xf32>
    %264 = arith.truncf %263 : vector<16x16xf32> to vector<16x16xbf16>
    %265 = arith.truncf %247 : vector<16x16xf32> to vector<16x16xbf16>
    %cst_193 = arith.constant dense<0.000000e+00> : vector<16x16xf32>
    %266 = tpu.matmul %264, %265, %cst_193 {dimension_numbers = #tpu.dot_dimension_numbers<[1], [0], [0], [1], [0, 0, 1, 1], [], []>} : vector<16x16xbf16>, vector<16x16xbf16>, vector<16x16xf32> -> vector<16x16xf32>
    %267 = arith.truncf %266 : vector<16x16xf32> to vector<16x16xbf16>
    %c1_194 = arith.constant 1 : index
    %c1_195 = arith.constant 1 : index
    %c0_196 = arith.constant 0 : index
    %c0_197 = arith.constant 0 : index
    %268 = vector.load %arg11[%c1_194, %c1_195, %c0_196, %c0_197] : memref<2x2x16x32xbf16, #tpu.memory_space<vmem>>, vector<1x1x16x32xbf16>
    %269 = vector.shape_cast %268 : vector<1x1x16x32xbf16> to vector<16x32xbf16>
    %cst_198 = arith.constant dense<0.000000e+00> : vector<16x32xf32>
    %270 = tpu.matmul %267, %269, %cst_198 {dimension_numbers = #tpu.dot_dimension_numbers<[1], [0], [0], [1], [0, 0, 1, 1], [], []>} : vector<16x16xbf16>, vector<16x32xbf16>, vector<16x32xf32> -> vector<16x32xf32>
    %271 = arith.addf %226, %270 : vector<16x32xf32>
    %c1_199 = arith.constant 1 : index
    %c0_200 = arith.constant 0 : index
    %c0_201 = arith.constant 0 : index
    %272 = vector.load %arg12[%c1_199, %c0_200, %c0_201] : memref<2x1x32xf32, #tpu.memory_space<vmem>>, vector<1x1x32xf32>
    %273 = vector.shape_cast %272 : vector<1x1x32xf32> to vector<1x32xf32>
    %274 = vector.broadcast %273 : vector<1x32xf32> to vector<16x32xf32>
    %275 = arith.addf %271, %274 : vector<16x32xf32>
    %276 = arith.addf %275, %179 : vector<16x32xf32>
    %c1_202 = arith.constant 1 : index
    %c0_203 = arith.constant 0 : index
    %c0_204 = arith.constant 0 : index
    %277 = vector.load %arg13[%c1_202, %c0_203, %c0_204] : memref<2x1x32xf32, #tpu.memory_space<vmem>>, vector<1x1x32xf32>
    %278 = vector.shape_cast %277 : vector<1x1x32xf32> to vector<1x32xf32>
    %c1_205 = arith.constant 1 : index
    %c0_206 = arith.constant 0 : index
    %c0_207 = arith.constant 0 : index
    %279 = vector.load %arg14[%c1_205, %c0_206, %c0_207] : memref<2x1x32xf32, #tpu.memory_space<vmem>>, vector<1x1x32xf32>
    %280 = vector.shape_cast %279 : vector<1x1x32xf32> to vector<1x32xf32>
    %cst_208 = arith.constant dense<0.000000e+00> : vector<16xf32>
    %281 = vector.multi_reduction <add>, %276, %cst_208 [1] : vector<16x32xf32> to vector<16xf32>
    %282 = vector.shape_cast %281 : vector<16xf32> to vector<16x1xf32>
    %cst_209 = arith.constant 3.200000e+01 : f32
    %283 = vector.broadcast %cst_209 : f32 to vector<16x1xf32>
    %284 = arith.divf %282, %283 : vector<16x1xf32>
    %285 = vector.broadcast %284 : vector<16x1xf32> to vector<16x32xf32>
    %286 = arith.subf %276, %285 : vector<16x32xf32>
    %287 = arith.mulf %286, %286 : vector<16x32xf32>
    %cst_210 = arith.constant dense<0.000000e+00> : vector<16xf32>
    %288 = vector.multi_reduction <add>, %287, %cst_210 [1] : vector<16x32xf32> to vector<16xf32>
    %289 = vector.shape_cast %288 : vector<16xf32> to vector<16x1xf32>
    %cst_211 = arith.constant 3.200000e+01 : f32
    %290 = vector.broadcast %cst_211 : f32 to vector<16x1xf32>
    %291 = arith.divf %289, %290 : vector<16x1xf32>
    %292 = vector.broadcast %284 : vector<16x1xf32> to vector<16x32xf32>
    %293 = arith.subf %276, %292 : vector<16x32xf32>
    %cst_212 = arith.constant 9.99999974E-6 : f32
    %294 = vector.broadcast %cst_212 : f32 to vector<16x1xf32>
    %295 = arith.addf %291, %294 : vector<16x1xf32>
    %296 = math.rsqrt %295 : vector<16x1xf32>
    %297 = vector.broadcast %296 : vector<16x1xf32> to vector<16x32xf32>
    %298 = arith.mulf %293, %297 : vector<16x32xf32>
    %299 = vector.broadcast %278 : vector<1x32xf32> to vector<16x32xf32>
    %300 = arith.mulf %298, %299 : vector<16x32xf32>
    %301 = vector.broadcast %280 : vector<1x32xf32> to vector<16x32xf32>
    %302 = arith.addf %300, %301 : vector<16x32xf32>
    %303 = vector.broadcast %2 : vector<16x1xf32> to vector<16x32xf32>
    %304 = arith.mulf %302, %303 : vector<16x32xf32>
    %cst_213 = arith.constant dense<0.000000e+00> : vector<16x32xf32>
    %305 = tpu.matmul %3, %304, %cst_213 {dimension_numbers = #tpu.dot_dimension_numbers<[1], [0], [0], [1], [0, 0, 1, 1], [], []>} : vector<16x16xf32>, vector<16x32xf32>, vector<16x32xf32> -> vector<16x32xf32>
    %cst_214 = arith.constant dense<0.000000e+00> : vector<16x32xf32>
    %306 = tpu.matmul %4, %304, %cst_214 {dimension_numbers = #tpu.dot_dimension_numbers<[1], [0], [0], [1], [0, 0, 1, 1], [], []>} : vector<16x16xf32>, vector<16x32xf32>, vector<16x32xf32> -> vector<16x32xf32>
    %307 = tpu.concatenate %305, %304, %306 in 1 : vector<16x32xf32>, vector<16x32xf32>, vector<16x32xf32> -> vector<16x96xf32>
    %308 = arith.truncf %307 : vector<16x96xf32> to vector<16x96xbf16>
    %c1_215 = arith.constant 1 : index
    %c0_216 = arith.constant 0 : index
    %c0_217 = arith.constant 0 : index
    %309 = vector.load %arg15[%c1_215, %c0_216, %c0_217] : memref<2x96x64xbf16, #tpu.memory_space<vmem>>, vector<1x96x64xbf16>
    %310 = vector.shape_cast %309 : vector<1x96x64xbf16> to vector<96x64xbf16>
    %cst_218 = arith.constant dense<0.000000e+00> : vector<16x64xf32>
    %311 = tpu.matmul %308, %310, %cst_218 {dimension_numbers = #tpu.dot_dimension_numbers<[1], [0], [0], [1], [0, 0, 1, 1], [], []>} : vector<16x96xbf16>, vector<96x64xbf16>, vector<16x64xf32> -> vector<16x64xf32>
    %c1_219 = arith.constant 1 : index
    %c0_220 = arith.constant 0 : index
    %c0_221 = arith.constant 0 : index
    %312 = vector.load %arg16[%c1_219, %c0_220, %c0_221] : memref<2x1x64xf32, #tpu.memory_space<vmem>>, vector<1x1x64xf32>
    %313 = vector.shape_cast %312 : vector<1x1x64xf32> to vector<1x64xf32>
    %314 = vector.broadcast %313 : vector<1x64xf32> to vector<16x64xf32>
    %315 = arith.addf %311, %314 : vector<16x64xf32>
    %cst_222 = arith.constant 0.000000e+00 : f32
    %316 = vector.broadcast %cst_222 : f32 to vector<16x64xf32>
    %317 = arith.maximumf %315, %316 : vector<16x64xf32>
    %318 = arith.truncf %317 : vector<16x64xf32> to vector<16x64xbf16>
    %c1_223 = arith.constant 1 : index
    %c0_224 = arith.constant 0 : index
    %c0_225 = arith.constant 0 : index
    %319 = vector.load %arg17[%c1_223, %c0_224, %c0_225] : memref<2x64x32xbf16, #tpu.memory_space<vmem>>, vector<1x64x32xbf16>
    %320 = vector.shape_cast %319 : vector<1x64x32xbf16> to vector<64x32xbf16>
    %cst_226 = arith.constant dense<0.000000e+00> : vector<16x32xf32>
    %321 = tpu.matmul %318, %320, %cst_226 {dimension_numbers = #tpu.dot_dimension_numbers<[1], [0], [0], [1], [0, 0, 1, 1], [], []>} : vector<16x64xbf16>, vector<64x32xbf16>, vector<16x32xf32> -> vector<16x32xf32>
    %c1_227 = arith.constant 1 : index
    %c0_228 = arith.constant 0 : index
    %c0_229 = arith.constant 0 : index
    %322 = vector.load %arg18[%c1_227, %c0_228, %c0_229] : memref<2x1x32xf32, #tpu.memory_space<vmem>>, vector<1x1x32xf32>
    %323 = vector.shape_cast %322 : vector<1x1x32xf32> to vector<1x32xf32>
    %324 = vector.broadcast %323 : vector<1x32xf32> to vector<16x32xf32>
    %325 = arith.addf %321, %324 : vector<16x32xf32>
    %326 = arith.addf %325, %304 : vector<16x32xf32>
    %c1_230 = arith.constant 1 : index
    %c0_231 = arith.constant 0 : index
    %c0_232 = arith.constant 0 : index
    %327 = vector.load %arg19[%c1_230, %c0_231, %c0_232] : memref<2x1x32xf32, #tpu.memory_space<vmem>>, vector<1x1x32xf32>
    %328 = vector.shape_cast %327 : vector<1x1x32xf32> to vector<1x32xf32>
    %c1_233 = arith.constant 1 : index
    %c0_234 = arith.constant 0 : index
    %c0_235 = arith.constant 0 : index
    %329 = vector.load %arg20[%c1_233, %c0_234, %c0_235] : memref<2x1x32xf32, #tpu.memory_space<vmem>>, vector<1x1x32xf32>
    %330 = vector.shape_cast %329 : vector<1x1x32xf32> to vector<1x32xf32>
    %cst_236 = arith.constant dense<0.000000e+00> : vector<16xf32>
    %331 = vector.multi_reduction <add>, %326, %cst_236 [1] : vector<16x32xf32> to vector<16xf32>
    %332 = vector.shape_cast %331 : vector<16xf32> to vector<16x1xf32>
    %cst_237 = arith.constant 3.200000e+01 : f32
    %333 = vector.broadcast %cst_237 : f32 to vector<16x1xf32>
    %334 = arith.divf %332, %333 : vector<16x1xf32>
    %335 = vector.broadcast %334 : vector<16x1xf32> to vector<16x32xf32>
    %336 = arith.subf %326, %335 : vector<16x32xf32>
    %337 = arith.mulf %336, %336 : vector<16x32xf32>
    %cst_238 = arith.constant dense<0.000000e+00> : vector<16xf32>
    %338 = vector.multi_reduction <add>, %337, %cst_238 [1] : vector<16x32xf32> to vector<16xf32>
    %339 = vector.shape_cast %338 : vector<16xf32> to vector<16x1xf32>
    %cst_239 = arith.constant 3.200000e+01 : f32
    %340 = vector.broadcast %cst_239 : f32 to vector<16x1xf32>
    %341 = arith.divf %339, %340 : vector<16x1xf32>
    %342 = vector.broadcast %334 : vector<16x1xf32> to vector<16x32xf32>
    %343 = arith.subf %326, %342 : vector<16x32xf32>
    %cst_240 = arith.constant 9.99999974E-6 : f32
    %344 = vector.broadcast %cst_240 : f32 to vector<16x1xf32>
    %345 = arith.addf %341, %344 : vector<16x1xf32>
    %346 = math.rsqrt %345 : vector<16x1xf32>
    %347 = vector.broadcast %346 : vector<16x1xf32> to vector<16x32xf32>
    %348 = arith.mulf %343, %347 : vector<16x32xf32>
    %349 = vector.broadcast %328 : vector<1x32xf32> to vector<16x32xf32>
    %350 = arith.mulf %348, %349 : vector<16x32xf32>
    %351 = vector.broadcast %330 : vector<1x32xf32> to vector<16x32xf32>
    %352 = arith.addf %350, %351 : vector<16x32xf32>
    %353 = vector.broadcast %2 : vector<16x1xf32> to vector<16x32xf32>
    %354 = arith.mulf %352, %353 : vector<16x32xf32>
    %c0_241 = arith.constant 0 : index
    %c0_242 = arith.constant 0 : index
    %355 = vector.load %arg21[%c0_241, %c0_242] : memref<16x32xf32, #tpu.memory_space<vmem>>, vector<16x32xf32>
    tpu.vector_store %arg21[%c0_241, %c0_242], %354 {strides = array<i32>} : memref<16x32xf32, #tpu.memory_space<vmem>>, vector<16x32xf32>,
    return
  }
}

</mosaic_0001>

<bundles_post_ra>
// kernel: tpu_custom_call.1
= control target key start
LH: loop header
LB: loop body
LE: loop exit
PB: predicated region body
PF: predicated region fallthrough
CT: control target
= control target key end

     0   :  { %s3942_s0 = inlined_call_operand.vmem [shape: f32[16,32], index: 0, kind: input, shape index: {}]   ;;  %s3943_s1 = inlined_call_operand.vmem [shape: f32[16,16], index: 1, kind: input, shape index: {}]   ;;  %s3944_s2 = inlined_call_operand.vmem [shape: f32[16,1], index: 2, kind: input, shape index: {}]   ;;  %s3945_s3 = inlined_call_operand.vmem [shape: f32[16,16], index: 3, kind: input, shape index: {}]   ;;  %s3946_s4 = inlined_call_operand.vmem [shape: f32[16,16], index: 4, kind: input, shape index: {}]   ;;  %s3947_s5 = inlined_call_operand.vmem [shape: bf16[2,2,32,16], index: 5, kind: input, shape index: {}]   ;;  %s3948_s6 = inlined_call_operand.vmem [shape: f32[2,2,1,16], index: 6, kind: input, shape index: {}]   ;;  %s3949_s7 = inlined_call_operand.vmem [shape: bf16[2,2,32,16], index: 7, kind: input, shape index: {}]   ;;  %s3950_s8 = inlined_call_operand.vmem [shape: f32[2,2,1,16], index: 8, kind: input, shape index: {}]   ;;  %s3951_s9 = inlined_call_operand.vmem [shape: bf16[2,2,32,16], index: 9, kind: input, shape index: {}]   ;;  %s3952_s10 = inlined_call_operand.vmem [shape: f32[2,2,1,16], index: 10, kind: input, shape index: {}]   ;;  %s3953_s11 = inlined_call_operand.vmem [shape: bf16[2,2,16,32], index: 11, kind: input, shape index: {}]   ;;  %s3954_s12 = inlined_call_operand.vmem [shape: f32[2,1,32], index: 12, kind: input, shape index: {}]   ;;  %s3955_s13 = inlined_call_operand.vmem [shape: f32[2,1,32], index: 13, kind: input, shape index: {}]   ;;  %s3956_s14 = inlined_call_operand.vmem [shape: f32[2,1,32], index: 14, kind: input, shape index: {}]   ;;  %s3957_s15 = inlined_call_operand.vmem [shape: bf16[2,96,64], index: 15, kind: input, shape index: {}]   ;;  %s3958_s16 = inlined_call_operand.vmem [shape: f32[2,1,64], index: 16, kind: input, shape index: {}]   ;;  %s3959_s17 = inlined_call_operand.vmem [shape: bf16[2,64,32], index: 17, kind: input, shape index: {}]   ;;  %s3960_s18 = inlined_call_operand.vmem [shape: f32[2,1,32], index: 18, kind: input, shape index: {}]   ;;  %s3961_s19 = inlined_call_operand.vmem [shape: f32[2,1,32], index: 19, kind: input, shape index: {}]   ;;  %s3962_s20 = inlined_call_operand.vmem [shape: f32[2,1,32], index: 20, kind: input, shape index: {}]   ;;  %s3963_s21 = inlined_call_operand.hbm [shape: f32[16,32], index: 21, kind: output, shape index: {}]  }
   0x1   :  { %3970 = sst [smem:[#allocation5_spill]] %s3942_s0 }
   0x2   :  { %3971 = sst [smem:[#allocation6_spill]] %s3943_s1 }
   0x3   :  { %3972 = sst [smem:[#allocation7_spill]] %s3944_s2 }
   0x4   :  { %3973 = sst [smem:[#allocation8_spill]] %s3945_s3 }
   0x5   :  { %3974 = sst [smem:[#allocation9_spill]] %s3946_s4 }
   0x6   :  { %3975 = sst [smem:[#allocation10_spill]] %s3947_s5 }
   0x7   :  { %v3135_v0 = vld [vmem:[%s3949_s7] sm:$0xff]   ;;  %v3255_v1 = vmov 0.0   ;;  %v3136_v2 = vld [vmem:[%s3949_s7 + $0x8] sm:$0xff]   ;;  %s3976_s29 = sld [smem:[#allocation10_spill]]  ;;  %vm3256_vm0 = vmmov 0   ;;  %s3977_s30 = sld [smem:[#allocation5_spill]] }
   0x8   :  { %2845 = vmatprep.subr.bf16.mxu1 %v3255_v1  ;;  %2837 = vmatprep.subr.bf16.mxu0 %v3255_v1  ;;  %vm104_vm1 = vcmask 261120  }
   0x9   :  { %2846 = vmatpush3.bf16.msra.mxu1 %v3135_v0  ;;  %2849 = vmatprep.mubr.msk.bf16.mxu1 %vm3256_vm0, %v3255_v1 }
   0xa   :  { %2847 = vmatprep.subr.bf16.mxu1 %v3255_v1  ;;  %2841 = vmatprep.mubr.msk.bf16.mxu0 %vm3256_vm0, %v3255_v1 }
   0xd   :  { %v3137_v3 = vld [vmem:[%s3976_s29] sm:$0xff]   ;;  %v3395_v5 = vld [vmem:[%s3977_s30 + $0x8] sm:$0xff]  ;;  %2848 = vmatpush3.bf16.msra.mxu1 %v3136_v2 }
   0xe   :  { %v3390_v4 = vld [vmem:[%s3977_s30] sm:$0xff]  ;;  %2838 = vmatpush3.bf16.msra.mxu0 %v3137_v3  ;;  %v3138_v6 = vld [vmem:[%s3976_s29 + $0x8] sm:$0xff]   ;;  %2861 = vmatprep.subr.bf16.mxu1 %v3255_v1 }
   0xf   :  { %v3404_v7 = vpack.c.bf16 %v3395_v5, %v3390_v4  ;;  %2839 = vmatprep.subr.bf16.mxu0 %v3255_v1 }
  0x11   :  { %2850 = vmatmul.mubr.msk.bf16.vlgmr.msra.gmra.mrb[0].mxu1 %vm104_vm1, %v3404_v7 }
  0x12   :  { %2840 = vmatpush3.bf16.msra.mxu0 %v3138_v6  ;;  %2863 = vmatprep.mubr.msk.bf16.mxu1 %vm3256_vm0, %v3255_v1 }
  0x13   :  { %2853 = vmatprep.subr.bf16.mxu0 %v3255_v1 }
  0x15   :  { %2842 = vmatmul.mubr.msk.bf16.vlgmr.msra.gmra.mrb[0].mxu0 %vm104_vm1, %v3404_v7 }
  0x16   :  { %2857 = vmatprep.mubr.msk.bf16.mxu0 %vm3256_vm0, %v3255_v1 }
  0x17   :  { %26 = vsyncpa [#allocation3], 0  ;;  %v2553_v8 = vld [vmem:[%s3950_s8] ss:$0 sm:$0xff]  ;;  %vm279_vm2 = vcmask 130048   ;;  %v3140_v26 = vld [vmem:[%s3951_s9 + $0x8] sm:$0xff]  }
  0x18   :  { %v2549_v10 = vld [vmem:[%s3948_s6] ss:$0 sm:$0xff]  ;;  %s3978_s5 = sld [smem:[#allocation6_spill]]  ;;  %v3143_v57 = vld [vmem:[%s3976_s29 + $0x10] sm:$0xff]   ;;  %v3144_v58 = vld [vmem:[%s3976_s29 + $0x18] sm:$0xff]   ;;  %s3979_s1 = sld [smem:[#allocation7_spill]] }
  0x19   :  { %v3139_v25 = vld [vmem:[%s3951_s9] sm:$0xff]   ;;  %v3141_v2 = vld [vmem:[%s3949_s7 + $0x10] sm:$0xff]   ;;  %v3142_v6 = vld [vmem:[%s3949_s7 + $0x18] sm:$0xff]   ;;  %s3980_s27 = sld [smem:[#allocation8_spill]]  ;;  %s3981_s0 = sld [smem:[#allocation9_spill]]  ;;  %vm1073_vm3 = vcmask 523264  }
  0x1a   :  { %2854 = vmatpush3.bf16.msra.mxu0 %v3139_v25  ;;  %v2557_v52 = vld [vmem:[%s3952_s10] ss:$0 sm:$0xff]  ;;  %s3258_s23 = smov 32   ;;  %s3259_s28 = smov 64   ;;  %vm1132_vm4 = vcmask 785408  }
  0x1b   :  { %2855 = vmatprep.subr.bf16.mxu0 %v3255_v1 }
  0x1e   :  { %2856 = vmatpush3.bf16.msra.mxu0 %v3140_v26  ;;  %v3443_v28 = vld [vmem:[%s3978_s5] sm:$0xff]  ;;  %v3448_v32 = vld [vmem:[%s3978_s5 + $0x8] sm:$0xff] }
  0x1f   :  { %2867 = vmatprep.subr.bf16.mxu0 %v3255_v1 }
  0x21   :  { %2858 = vmatmul.mubr.msk.bf16.vlgmr.msra.gmra.mrb[4].mxu0 %vm104_vm1, %v3404_v7 }
  0x22   :  { %2869 = vmatprep.mubr.msk.bf16.mxu0 %vm3256_vm0, %v3255_v1 }
  0xe4   :  { %v206_v9 = vpop.f32.mrb[0].mxu1 }
  0xe5   :  { %v2851_v11 = vpop.f32.mrb[1].mxu1  ;;  %v207_v14 = vadd.f32 %v2553_v8, %v206_v9 }
  0xe6   :  { %v209_v12 = vpop.f32.mrb[2].mxu1 }
  0xe7   :  { %v210_v15 = vadd.f32 %v2553_v8, %v209_v12  ;;  %v2852_v16 = vpop.f32.mrb[3].mxu1  ;;  %v2568_v8 = vld [vmem:[%s3948_s6 + $0x1] ss:$0 sm:$0xff] }
  0xe8   :  { %v142_v13 = vpop.f32.mrb[0].mxu0 }
  0xe9   :  { %v143_v17 = vadd.f32 %v2549_v10, %v142_v13  ;;  %v2843_v18 = vpop.f32.mrb[1].mxu0  ;;  %v278_v20 = vpack.c.bf16 %v210_v15, %v207_v14 }
  0xea   :  { %v145_v19 = vpop.f32.mrb[2].mxu0 }
  0xeb   :  { %v146_v21 = vadd.f32 %v2549_v10, %v145_v19  ;;  %v2844_v22 = vpop.f32.mrb[3].mxu0  ;;  %v284_v24 = vsel %vm279_vm2, %v278_v20, 0 }
  0xec   :  { %2862 = vmatpush3.bf16.xpose.msra.mxu1 %v284_v24 }
  0xed   :  { %v277_v23 = vpack.c.bf16 %v146_v21, %v143_v17  ;;  %2873 = vmatprep.subr.bf16.mxu1 %v3255_v1  ;;  %v2577_v21 = vld [vmem:[%s3950_s8 + $0x1] ss:$0 sm:$0xff] }
  0xf3   :  { %2864 = vmatmul.mubr.msk.bf16.vlgmr.msra.gmra.mrb[4].mxu1 %vm279_vm2, %v277_v23 }
  0xf4   :  { %2877 = vmatprep.mubr.msk.bf16.mxu1 %vm3256_vm0, %v3255_v1  ;;  %v270_v49 = vpop.f32.mrb[4].mxu0  ;;  %2874 = vmatpush3.bf16.msra.mxu1 %v3143_v57 }
  0xf5   :  { %v2859_v50 = vpop.f32.mrb[5].mxu0  ;;  %v271_v54 = vadd.f32 %v2557_v52, %v270_v49  ;;  %2875 = vmatprep.subr.bf16.mxu1 %v3255_v1 }
  0xf6   :  { %v273_v51 = vpop.f32.mrb[6].mxu0 }
  0xf7   :  { %v2860_v53 = vpop.f32.mrb[7].mxu0  ;;  %v274_v55 = vadd.f32 %v2557_v52, %v273_v51 }
  0xf8   :  { %2876 = vmatpush3.bf16.msra.mxu1 %v3144_v58 }
  0xf9   :  { %v354_v56 = vpack.c.bf16 %v274_v55, %v271_v54  ;;  %2889 = vmatprep.subr.bf16.mxu1 %v3255_v1 }
  0xfb   :  { %2868 = vmatpush3.bf16.msra.mxu0 %v354_v56  ;;  %2878 = vmatmul.mubr.msk.bf16.vlgmr.msra.gmra.mrb[8].mxu1 %vm104_vm1, %v3404_v7  ;;  %v2586_v56 = vld [vmem:[%s3952_s10 + $0x1] ss:$0 sm:$0xff] }
  0xfc   :  { %2881 = vmatprep.subr.bf16.mxu0 %v3255_v1  ;;  %2893 = vmatprep.mubr.msk.bf16.mxu1 %vm3256_vm0, %v3255_v1 }
 0x1c6   :  { %v320_v27 = vpop.f32.mrb[4].mxu1 }
 0x1c7   :  { %v327_v29 = vmul.f32 0.25, %v320_v27  ;;  %v2865_v30 = vpop.f32.mrb[5].mxu1 }
 0x1c8   :  { %v323_v31 = vpop.f32.mrb[6].mxu1 }
 0x1c9   :  { %v328_v33 = vmul.f32 0.25, %v323_v31  ;;  %v2866_v34 = vpop.f32.mrb[7].mxu1  ;;  %v329_v35 = vadd.f32 %v327_v29, %v3443_v28  ;;  %v3145_v31 = vld [vmem:[%s3951_s9 + $0x10] sm:$0xff]  }
 0x1ca   :  { %2890 = vmatpush3.bf16.msra.mxu1 %v3145_v31 }
 0x1cb   :  { %v331_v36 = vsel %vm279_vm2, %v329_v35, -inf  ;;  %v330_v37 = vadd.f32 %v328_v33, %v3448_v32  ;;  %v3146_v33 = vld [vmem:[%s3951_s9 + $0x18] sm:$0xff]   ;;  %2891 = vmatprep.subr.bf16.mxu1 %v3255_v1 }
 0x1cc   :  { %332 = vmax.xlane.f32.xlu0 %v331_v36 }
 0x1cd   :  { %v334_v38 = vsel %vm279_vm2, %v330_v37, -inf }
 0x1ce   :  { %v461_v9 = vpop.f32.mrb[8].mxu1  ;;  %2892 = vmatpush3.bf16.msra.mxu1 %v3146_v33 }
 0x1cf   :  { %v462_v10 = vadd.f32 %v2568_v8, %v461_v9  ;;  %v2879_v11 = vpop.f32.mrb[9].mxu1  ;;  %2903 = vmatprep.subr.bf16.mxu1 %v3255_v1  ;;  %v3148_v9 = vld [vmem:[%s3953_s11 + $0x8] sm:$0xff]  }
 0x1d0   :  { %335 = vmax.xlane.f32.xlu0 %v334_v38  ;;  %v464_v12 = vpop.f32.mrb[10].mxu1 }
 0x1d1   :  { %v465_v13 = vadd.f32 %v2568_v8, %v464_v12  ;;  %v2880_v14 = vpop.f32.mrb[11].mxu1  ;;  %2894 = vmatmul.mubr.msk.bf16.vlgmr.msra.gmra.mrb[12].mxu1 %vm104_vm1, %v3404_v7 }
 0x1d2   :  { %2905 = vmatprep.mubr.msk.bf16.mxu1 %vm3256_vm0, %v3255_v1 }
 0x1d3   :  { %v600_v15 = vpack.c.bf16 %v465_v13, %v462_v10 }
 0x259   :  { %v333_v39 = vpop.xlane.xlu0 %332 }
 0x25a   :  { %v337_v40 = vsub.f32 %v329_v35, %v333_v39 }
 0x25c   :  { %v339_v41 = vmul.f32 1.442695, %v337_v40 }
 0x25d   :  { %v336_v42 = vpop.xlane.xlu0 %335 }
 0x25e   :  { %3183 = vpow2.f32 %v339_v41  ;;  %v338_v43 = vsub.f32 %v330_v37, %v336_v42 }
 0x260   :  { %v341_v44 = vmul.f32 1.442695, %v338_v43 }
 0x262   :  { %3185 = vpow2.f32 %v341_v44 }
 0x268   :  { %v3184_v45 = vpop.eup %3183 }
 0x269   :  { %v343_v46 = vsel %vm279_vm2, %v3184_v45, 0.0 }
 0x26a   :  { %344 = vadd.xlane.f32.xlu1 %v343_v46 }
 0x26c   :  { %v3186_v47 = vpop.eup %3185 }
 0x26d   :  { %v346_v48 = vsel %vm279_vm2, %v3186_v47, 0.0 }
 0x26e   :  { %347 = vadd.xlane.f32.xlu1 %v346_v48 }
 0x2a4   :  { %v593_v53 = vpop.f32.mrb[12].mxu1 }
 0x2a5   :  { %v2895_v54 = vpop.f32.mrb[13].mxu1  ;;  %v594_v58 = vadd.f32 %v2586_v56, %v593_v53  ;;  %v2599_v53 = vld [vmem:[%s3955_s13] ss:$0 sm:$0xff] }
 0x2a6   :  { %v596_v55 = vpop.f32.mrb[14].mxu1 }
 0x2a7   :  { %v2896_v57 = vpop.f32.mrb[15].mxu1 }
 0x2f7   :  { %v345_v59 = vpop.xlane.xlu1 %344 }
 0x2f8   :  { %3187 = vrcp.f32 %v345_v59  ;;  %v597_v59 = vadd.f32 %v2586_v56, %v596_v55  ;;  %v2600_v56 = vld [vmem:[%s3956_s14] ss:$0 sm:$0xff] }
 0x2fb   :  { %v348_v60 = vpop.xlane.xlu1 %347 }
 0x2fc   :  { %3189 = vrcp.f32 %v348_v60  ;;  %v676_v60 = vpack.c.bf16 %v597_v59, %v594_v58 }
 0x2fe   :  { %2904 = vmatpush3.bf16.msra.mxu1 %v676_v60 }
 0x2ff   :  { %2915 = vmatprep.subr.bf16.mxu1 %v3255_v1 }
 0x302   :  { %v3188_v61 = vpop.eup %3187 }
 0x303   :  { %v351_v63 = vmul.f32 %v3188_v61, %v3184_v45 }
 0x306   :  { %v3190_v62 = vpop.eup %3189 }
 0x307   :  { %v352_v0 = vmul.f32 %v3190_v62, %v3186_v47 }
 0x309   :  { %v353_v3 = vpack.c.bf16 %v352_v0, %v351_v63 }
 0x30b   :  { %2870 = vmatmul.mubr.msk.bf16.vlgmr.msra.gmra.mrb[8].mxu0 %vm279_vm2, %v353_v3 }
 0x30c   :  { %2882 = vmatpush3.bf16.msra.mxu0 %v3141_v2  ;;  %2885 = vmatprep.mubr.msk.bf16.mxu0 %vm3256_vm0, %v3255_v1 }
 0x30d   :  { %2883 = vmatprep.subr.bf16.mxu0 %v3255_v1 }
 0x310   :  { %2884 = vmatpush3.bf16.msra.mxu0 %v3142_v6  ;;  %v3147_v6 = vld [vmem:[%s3953_s11] sm:$0xff]  }
 0x311   :  { %2897 = vmatprep.subr.bf16.mxu0 %v3255_v1 }
 0x313   :  { %2886 = vmatmul.mubr.msk.bf16.vlgmr.msra.gmra.mrb[12].mxu0 %vm104_vm1, %v3404_v7 }
 0x314   :  { %2899 = vmatprep.mubr.msk.bf16.mxu0 %vm3256_vm0, %v3255_v1 }
 0x3de   :  { %v3490_v16 = vpop.f32.mrb[8].mxu0 }
 0x3df   :  { %v2871_v17 = vpop.f32.mrb[9].mxu0 }
 0x3e0   :  { %v3492_v18 = vpop.f32.mrb[10].mxu0 }
 0x3e1   :  { %v399_v19 = vpack.c.bf16 %v3492_v18, %v3490_v16  ;;  %v2872_v20 = vpop.f32.mrb[11].mxu0  ;;  %v2598_v16 = vld [vmem:[%s3954_s12] ss:$0 sm:$0xff] }
 0x3e6   :  { %v527_v22 = vpop.f32.mrb[12].mxu0 }
 0x3e7   :  { %v2887_v23 = vpop.f32.mrb[13].mxu0  ;;  %v528_v25 = vadd.f32 %v2577_v21, %v527_v22 }
 0x3e8   :  { %v530_v24 = vpop.f32.mrb[14].mxu0 }
 0x3e9   :  { %v531_v26 = vadd.f32 %v2577_v21, %v530_v24  ;;  %v2888_v27 = vpop.f32.mrb[15].mxu0 }
 0x3eb   :  { %v601_v29 = vpack.c.bf16 %v531_v26, %v528_v25 }
 0x3ed   :  { %v606_v30 = vsel %vm279_vm2, %v601_v29, 0 }
 0x3ee   :  { %2898 = vmatpush3.bf16.xpose.msra.mxu0 %v606_v30 }
 0x3ef   :  { %2909 = vmatprep.subr.bf16.mxu0 %v3255_v1 }
 0x3f5   :  { %2900 = vmatmul.mubr.msk.bf16.vlgmr.msra.gmra.mrb[16].mxu0 %vm279_vm2, %v600_v15 }
 0x3f6   :  { %2911 = vmatprep.mubr.msk.bf16.mxu0 %vm3256_vm0, %v3255_v1  ;;  %2910 = vmatpush3.bf16.msra.mxu0 %v3148_v9  ;;  %v3598_v9 = vld [vmem:[%s3981_s0 + $0x8] sm:$0xff] }
 0x4c8   :  { %v642_v34 = vpop.f32.mrb[16].mxu0 }
 0x4c9   :  { %v649_v35 = vmul.f32 0.25, %v642_v34  ;;  %v2901_v36 = vpop.f32.mrb[17].mxu0  ;;  %v3257_v34 = vmov 0  }
 0x4ca   :  { %v645_v37 = vpop.f32.mrb[18].mxu0  ;;  %3113 = vset.pattern.permute.xlu0 %v3257_v34  ;;  %3114 = vset.pattern.permute.xlu1 %v3257_v34 }
 0x4cb   :  { %v650_v38 = vmul.f32 0.25, %v645_v37  ;;  %v2902_v39 = vpop.f32.mrb[19].mxu0  ;;  %v651_v40 = vadd.f32 %v649_v35, %v3443_v28 }
 0x4cd   :  { %v653_v41 = vsel %vm279_vm2, %v651_v40, -inf  ;;  %v652_v42 = vadd.f32 %v650_v38, %v3448_v32 }
 0x4ce   :  { %654 = vmax.xlane.f32.xlu0 %v653_v41 }
 0x4cf   :  { %v656_v43 = vsel %vm279_vm2, %v652_v42, -inf }
 0x4d0   :  { %657 = vmax.xlane.f32.xlu1 %v656_v43  ;;  %v75_v43 = vld [vmem:[%s3979_s1 + $0x8] sm:$0xff] }
 0x55b   :  { %v655_v7 = vpop.xlane.xlu0 %654 }
 0x55c   :  { %v659_v44 = vsub.f32 %v651_v40, %v655_v7  ;;  %v74_v7 = vld [vmem:[%s3979_s1] sm:$0xff] }
 0x55d   :  { %v658_v45 = vpop.xlane.xlu1 %657 }
 0x55e   :  { %v661_v46 = vmul.f32 1.442695, %v659_v44  ;;  %v660_v47 = vsub.f32 %v652_v42, %v658_v45  ;;  %v3558_v44 = vld [vmem:[%s3980_s27] sm:$0xff] }
 0x55f   :  { %v3563_v45 = vld [vmem:[%s3981_s0] sm:$0xff] }
 0x560   :  { %3191 = vpow2.f32 %v661_v46  ;;  %v663_v48 = vmul.f32 1.442695, %v660_v47 }
 0x562   :  { %3193 = vpow2.f32 %v663_v48 }
 0x56a   :  { %v3192_v49 = vpop.eup %3191 }
 0x56b   :  { %v665_v50 = vsel %vm279_vm2, %v3192_v49, 0.0 }
 0x56c   :  { %v3194_v51 = vpop.eup %3193  ;;  %666 = vadd.xlane.f32.xlu0 %v665_v50 }
 0x56d   :  { %v668_v52 = vsel %vm279_vm2, %v3194_v51, 0.0 }
 0x56e   :  { %669 = vadd.xlane.f32.xlu1 %v668_v52 }
 0x5f9   :  { %v667_v61 = vpop.xlane.xlu0 %666 }
 0x5fa   :  { %3195 = vrcp.f32 %v667_v61 }
 0x5fb   :  { %v670_v62 = vpop.xlane.xlu1 %669 }
 0x5fc   :  { %3197 = vrcp.f32 %v670_v62 }
 0x604   :  { %v3196_v63 = vpop.eup %3195 }
 0x605   :  { %v673_v2 = vmul.f32 %v3196_v63, %v3192_v49 }
 0x606   :  { %v3198_v0 = vpop.eup %3197 }
 0x607   :  { %v674_v3 = vmul.f32 %v3198_v0, %v3194_v51 }
 0x609   :  { %v675_v8 = vpack.c.bf16 %v674_v3, %v673_v2 }
 0x60b   :  { %2906 = vmatmul.mubr.msk.bf16.vlgmr.msra.gmra.mrb[16].mxu1 %vm279_vm2, %v675_v8  ;;  %v3593_v8 = vld [vmem:[%s3980_s27 + $0x8] sm:$0xff] }
 0x60c   :  { %2916 = vmatpush3.bf16.msra.mxu1 %v3147_v6  ;;  %2917 = vmatprep.mubr.msk.bf16.mxu1 %vm3256_vm0, %v3255_v1 }
 0x613   :  { %2918 = vmatmul.mubr.msk.bf16.vlgmr.msra.gmra.mrb[20].mxu1 %vm279_vm2, %v399_v19 }
 0x614   :  { %2932 = vmatprep.mubr.msk.f32.mxu1 %vm279_vm2, %v3563_v45 }
 0x6de   :  { %v714_v10 = vpop.f32.mrb[16].mxu1 }
 0x6df   :  { %v2907_v11 = vpop.f32.mrb[17].mxu1 }
 0x6e0   :  { %v717_v12 = vpop.f32.mrb[18].mxu1  ;;  %v3150_v11 = vld [vmem:[%s3957_s15 + $0x8] sm:$0xff]  }
 0x6e1   :  { %v721_v13 = vpack.c.bf16 %v717_v12, %v714_v10  ;;  %v2908_v14 = vpop.f32.mrb[19].mxu1  ;;  %v3149_v10 = vld [vmem:[%s3957_s15] sm:$0xff]   ;;  %v3151_v12 = vld [vmem:[%s3957_s15 + $0x10] sm:$0xff]  }
 0x6e2   :  { %v3153_v14 = vld [vmem:[%s3957_s15 + $0x20] sm:$0xff]  }
 0x6e3   :  { %2912 = vmatmul.mubr.msk.bf16.vlgmr.msra.gmra.mrb[20].mxu0 %vm279_vm2, %v721_v13  ;;  %v3152_v13 = vld [vmem:[%s3957_s15 + $0x18] sm:$0xff]  }
 0x6e4   :  { %2925 = vmatprep.mubr.msk.f32.mxu0 %vm279_vm2, %v3558_v44 }
 0x6e6   :  { %v818_v15 = vpop.f32.mrb[20].mxu1 }
 0x6e7   :  { %v2919_v17 = vpop.f32.mrb[21].mxu1 }
 0x6e8   :  { %v821_v20 = vpop.f32.mrb[22].mxu1  ;;  %v3155_v17 = vld [vmem:[%s3959_s17] sm:$0xff]  }
 0x6e9   :  { %v2920_v21 = vpop.f32.mrb[23].mxu1 }
 0x7b6   :  { %v768_v22 = vpop.f32.mrb[20].mxu0 }
 0x7b7   :  { %v819_v18 = vadd.f32 %v818_v15, %v768_v22  ;;  %v2913_v19 = vpop.f32.mrb[21].mxu0  ;;  %v3154_v15 = vld [vmem:[%s3957_s15 + $0x28] sm:$0xff]  }
 0x7b8   :  { %v771_v23 = vpop.f32.mrb[22].mxu0 }
 0x7b9   :  { %v832_v24 = vadd.f32 %v2598_v16, %v819_v18  ;;  %v822_v25 = vadd.f32 %v821_v20, %v771_v23  ;;  %v2914_v26 = vpop.f32.mrb[23].mxu0  ;;  %v3156_v20 = vld [vmem:[%s3959_s17 + $0x8] sm:$0xff]  }
 0x7bb   :  { %v833_v27 = vadd.f32 %v2598_v16, %v822_v25  ;;  %v834_v29 = vadd.f32 %v832_v24, %v3390_v4 }
 0x7bd   :  { %v838_v30 = vsel %vm104_vm1, %v834_v29, 0.0  ;;  %v835_v31 = vadd.f32 %v833_v27, %v3395_v5 }
 0x7be   :  { %839 = vadd.xlane.f32.xlu0 %v838_v30 }
 0x7bf   :  { %v841_v33 = vsel %vm104_vm1, %v835_v31, 0.0 }
 0x7c0   :  { %842 = vadd.xlane.f32.xlu1 %v841_v33 }
 0x84b   :  { %v840_v35 = vpop.xlane.xlu0 %839 }
 0x84c   :  { %v845_v36 = vmul.f32 0.03125, %v840_v35 }
 0x84d   :  { %v843_v37 = vpop.xlane.xlu1 %842 }
 0x84e   :  { %v847_v38 = vsub.f32 %v834_v29, %v845_v36  ;;  %v846_v39 = vmul.f32 0.03125, %v843_v37  ;;  %v3157_v36 = vld [vmem:[%s3959_s17 + $0x10] sm:$0xff]   ;;  %v3158_v37 = vld [vmem:[%s3959_s17 + $0x18] sm:$0xff]  }
 0x850   :  { %v848_v40 = vsub.f32 %v835_v31, %v846_v39  ;;  %v849_v41 = vmul.f32 %v847_v38, %v847_v38 }
 0x852   :  { %v851_v4 = vsel %vm104_vm1, %v849_v41, 0.0  ;;  %v850_v42 = vmul.f32 %v848_v40, %v848_v40 }
 0x853   :  { %852 = vadd.xlane.f32.xlu0 %v851_v4 }
 0x854   :  { %v854_v5 = vsel %vm104_vm1, %v850_v42, 0.0 }
 0x855   :  { %855 = vadd.xlane.f32.xlu1 %v854_v5 }
 0x866   :  { %888 = vperm.xlu1 %3114, %v75_v43  }
 0x869   :  { %883 = vperm.xlu0 %3113, %v74_v7  }
 0x8e0   :  { %v853_v46 = vpop.xlane.xlu0 %852 }
 0x8e1   :  { %v857_v47 = vmul.f32 0.03125, %v853_v46 }
 0x8e2   :  { %v856_v48 = vpop.xlane.xlu1 %855 }
 0x8e3   :  { %v859_v49 = vadd.f32 1e-05, %v857_v47  ;;  %v858_v50 = vmul.f32 0.03125, %v856_v48  ;;  %v2613_v47 = vld [vmem:[%s3960_s18] ss:$0 sm:$0xff] }
 0x8e5   :  { %3199 = vrsqrt.f32 %v859_v49  ;;  %v860_v51 = vadd.f32 1e-05, %v858_v50 }
 0x8e6   :  { %v3577_v62 = vpop.permute.xlu1 %888 }
 0x8e7   :  { %3201 = vrsqrt.f32 %v860_v51 }
 0x8e8   :  { %v3575_v61 = vpop.permute.xlu0 %883 }
 0x8ef   :  { %v3200_v52 = vpop.eup %3199 }
 0x8f0   :  { %v863_v54 = vmul.f32 %v3200_v52, %v847_v38  ;;  %v2605_v38 = vld [vmem:[%s3958_s16] ss:$0 sm:$0xff] }
 0x8f1   :  { %v3202_v55 = vpop.eup %3201 }
 0x8f2   :  { %v871_v57 = vmul.f32 %v2599_v53, %v863_v54  ;;  %v864_v58 = vmul.f32 %v3202_v55, %v848_v40 }
 0x8f4   :  { %v879_v59 = vadd.f32 %v2600_v56, %v871_v57  ;;  %v872_v60 = vmul.f32 %v2599_v53, %v864_v58 }
 0x8f6   :  { %v880_v63 = vadd.f32 %v2600_v56, %v872_v60  ;;  %v3580_v0 = vmul.f32 %v3575_v61, %v879_v59 }
 0x8f8   :  { %v3583_v2 = vmul.f32 %v3577_v62, %v880_v63 }
 0x8fa   :  { %v3115_v3 = vpack.i.bf16 %v3583_v2, %v3580_v0  ;;  %v3089_v6 = vpack.c.bf16 %v3583_v2, %v3580_v0 }
 0x8fc   :  { %3116 = vrot.lane.b32.xlu1 %v3115_v3, %s3258_s23  ;;  %3090 = vmatprep.subr.bf16.mxu0 %v3089_v6 }
 0x8fd   :  { %3094 = vmatprep.subr.bf16.mxu1 %v3089_v6  ;;  %3092 = vmatpush3.bf16.msra.mxu0 %v3089_v6 }
 0x8fe   :  { %3096 = vmatpush3.bf16.msra.mxu1 %v3089_v6  ;;  %2935 = vmatprep.subr.bf16.mxu0 %v3255_v1 }
 0x8ff   :  { %2951 = vmatprep.subr.bf16.mxu1 %v3255_v1 }
 0x900   :  { %2926 = vmatmul.mubr.msk.f32.vlgmr.msra.gmra.mrb[24].mxu0 %vm279_vm2, %v3593_v8 }
 0x901   :  { %2933 = vmatmul.mubr.msk.f32.vlgmr.msra.gmra.mrb[24].mxu1 %vm279_vm2, %v3598_v9  ;;  %2947 = vmatprep.mubr.msk.bf16.mxu0 %vm3256_vm0, %v3255_v1 }
 0x902   :  { %2959 = vmatprep.mubr.msk.bf16.mxu1 %vm3256_vm0, %v3255_v1  ;;  %2936 = vmatpush3.bf16.msra.mxu0 %v3149_v10 }
 0x903   :  { %2937 = vmatprep.subr.bf16.mxu0 %v3255_v1  ;;  %2952 = vmatpush3.bf16.msra.mxu1 %v3155_v17 }
 0x904   :  { %2953 = vmatprep.subr.bf16.mxu1 %v3255_v1 }
 0x906   :  { %2938 = vmatpush3.bf16.msra.mxu0 %v3150_v11 }
 0x907   :  { %2939 = vmatprep.subr.bf16.mxu0 %v3255_v1  ;;  %2954 = vmatpush3.bf16.msra.mxu1 %v3156_v20 }
 0x908   :  { %2955 = vmatprep.subr.bf16.mxu1 %v3255_v1 }
 0x90a   :  { %2940 = vmatpush3.bf16.msra.mxu0 %v3151_v12 }
 0x90b   :  { %2941 = vmatprep.subr.bf16.mxu0 %v3255_v1  ;;  %2956 = vmatpush3.bf16.msra.mxu1 %v3157_v36  ;;  %v3163_v36 = vld [vmem:[%s3951_s9 + $0x20] sm:$0xff]  }
 0x90c   :  { %2957 = vmatprep.subr.bf16.mxu1 %v3255_v1 }
 0x90e   :  { %2942 = vmatpush3.bf16.msra.mxu0 %v3152_v13  ;;  %v3160_v13 = vld [vmem:[%s3949_s7 + $0x20] sm:$0xff]  }
 0x90f   :  { %2943 = vmatprep.subr.bf16.mxu0 %v3255_v1  ;;  %2958 = vmatpush3.bf16.msra.mxu1 %v3158_v37 }
 0x910   :  { %2963 = vmatprep.subr.bf16.mxu1 %v3255_v1 }
 0x912   :  { %2944 = vmatpush3.bf16.msra.mxu0 %v3153_v14  ;;  %v3161_v14 = vld [vmem:[%s3976_s29 + $0x28] sm:$0xff]  }
 0x913   :  { %2945 = vmatprep.subr.bf16.mxu0 %v3255_v1 }
 0x916   :  { %2946 = vmatpush3.bf16.msra.mxu0 %v3154_v15  ;;  %v3162_v15 = vld [vmem:[%s3949_s7 + $0x28] sm:$0xff]  }
 0x917   :  { %2971 = vmatprep.subr.bf16.mxu0 %v3255_v1 }
 0x96e   :  { %v3117_v23 = vpop.permute.xlu1 %3116 }
 0x96f   :  { %v3119_v24 = vunpack.i.h.bf16 %v3117_v23  ;;  %v3118_v25 = vunpack.i.l.bf16 %v3117_v23  ;;  %v2619_v23 = vld [vmem:[%s3961_s19] ss:$0 sm:$0xff] }
 0x9d3   :  { %v2927_v21 = vpop.f32.mrb[24].mxu0 }
 0x9d4   :  { %v2934_v22 = vpop.f32.mrb[24].mxu1  ;;  %v965_v16 = vpop.f32.mrb[25].mxu0  ;;  %v1072_v30 = vsel %vm104_vm1, %v2927_v21, %v3119_v24 }
 0x9d5   :  { %v1046_v18 = vpop.f32.mrb[25].mxu1  ;;  %v1071_v31 = vsel %vm104_vm1, %v965_v16, %v3118_v25 }
 0x9d6   :  { %v3120_v19 = vpack.i.bf16 %v2934_v22, %v1046_v18 }
 0x9d8   :  { %3121 = vrot.lane.b32.xlu1 %v3120_v19, %s3259_s28 }
 0xa4a   :  { %v3122_v26 = vpop.permute.xlu1 %3121 }
 0xa4b   :  { %v3124_v27 = vunpack.i.h.bf16 %v3122_v26  ;;  %v3123_v29 = vunpack.i.l.bf16 %v3122_v26 }
 0xa4d   :  { %v1074_v33 = vsel %vm1073_vm3, %v1071_v31, %v3123_v29  ;;  %v1075_v34 = vsel %vm1073_vm3, %v1072_v30, %v3124_v27  ;;  %v2620_v27 = vld [vmem:[%s3962_s20] ss:$0 sm:$0xff] }
 0xa4e   :  { %v1076_v35 = vpack.c.bf16 %v1075_v34, %v1074_v33 }
 0xa50   :  { %2948 = vmatmul.mubr.msk.bf16.vlgmr.msra.gmra.mrb[28].mxu0 %vm1132_vm4, %v1076_v35 }
 0xa51   :  { %2975 = vmatprep.mubr.msk.bf16.mxu0 %vm3256_vm0, %v3255_v1  ;;  %2972 = vmatpush3.bf16.msra.mxu0 %v3160_v13 }
 0xa52   :  { %2973 = vmatprep.subr.bf16.mxu0 %v3255_v1 }
 0xa55   :  { %2974 = vmatpush3.bf16.msra.mxu0 %v3162_v15 }
 0xa56   :  { %2987 = vmatprep.subr.bf16.mxu0 %v3255_v1 }
 0xb23   :  { %v1170_v39 = vpop.f32.mrb[28].mxu0 }
 0xb24   :  { %v1171_v40 = vadd.f32 %v2605_v38, %v1170_v39  ;;  %v2949_v41 = vpop.f32.mrb[29].mxu0  ;;  %v2626_v39 = vld [vmem:[%s3948_s6 + $0x2] ss:$0 sm:$0xff] }
 0xb25   :  { %v1173_v4 = vpop.f32.mrb[30].mxu0  ;;  %v2635_v41 = vld [vmem:[%s3950_s8 + $0x2] ss:$0 sm:$0xff] }
 0xb26   :  { %v1174_v42 = vadd.f32 %v2605_v38, %v1173_v4  ;;  %v2950_v5 = vpop.f32.mrb[31].mxu0  ;;  %v1177_v43 = vmax.f32 %v1171_v40, 0.0  ;;  %v3164_v38 = vld [vmem:[%s3951_s9 + $0x28] sm:$0xff]  }
 0xb28   :  { %v1178_v7 = vmax.f32 %v1174_v42, 0.0 }
 0xb2a   :  { %v1179_v46 = vpack.c.bf16 %v1178_v7, %v1177_v43 }
 0xb2c   :  { %2960 = vmatmul.mubr.msk.bf16.vlgmr.msra.gmra.mrb[28].mxu1 %vm1073_vm3, %v1179_v46 }
 0xb2d   :  { %2967 = vmatprep.mubr.msk.bf16.mxu1 %vm3256_vm0, %v3255_v1 }
 0xbff   :  { %v1256_v48 = vpop.f32.mrb[28].mxu1 }
 0xc00   :  { %v1257_v49 = vadd.f32 %v2613_v47, %v1256_v48  ;;  %v2961_v50 = vpop.f32.mrb[29].mxu1 }
 0xc01   :  { %v1259_v51 = vpop.f32.mrb[30].mxu1 }
 0xc02   :  { %v1260_v52 = vadd.f32 %v2613_v47, %v1259_v51  ;;  %v2962_v53 = vpop.f32.mrb[31].mxu1  ;;  %v1263_v54 = vadd.f32 %v1257_v49, %v3580_v0 }
 0xc04   :  { %v1267_v55 = vsel %vm104_vm1, %v1263_v54, 0.0  ;;  %v1264_v56 = vadd.f32 %v1260_v52, %v3583_v2  ;;  %v3159_v2 = vld [vmem:[%s3976_s29 + $0x20] sm:$0xff]  }
 0xc05   :  { %1268 = vadd.xlane.f32.xlu1 %v1267_v55  ;;  %2964 = vmatpush3.bf16.msra.mxu1 %v3159_v2  ;;  %v2644_v55 = vld [vmem:[%s3952_s10 + $0x2] ss:$0 sm:$0xff] }
 0xc06   :  { %v1270_v57 = vsel %vm104_vm1, %v1264_v56, 0.0  ;;  %2965 = vmatprep.subr.bf16.mxu1 %v3255_v1 }
 0xc07   :  { %1271 = vadd.xlane.f32.xlu0 %v1270_v57 }
 0xc09   :  { %2966 = vmatpush3.bf16.msra.mxu1 %v3161_v14 }
 0xc0a   :  { %2979 = vmatprep.subr.bf16.mxu1 %v3255_v1 }
 0xc92   :  { %v1269_v58 = vpop.xlane.xlu1 %1268 }
 0xc93   :  { %v1273_v59 = vmul.f32 0.03125, %v1269_v58 }
 0xc94   :  { %v1272_v60 = vpop.xlane.xlu0 %1271 }
 0xc95   :  { %v1275_v63 = vsub.f32 %v1263_v54, %v1273_v59  ;;  %v1274_v3 = vmul.f32 0.03125, %v1272_v60 }
 0xc97   :  { %v1276_v6 = vsub.f32 %v1264_v56, %v1274_v3  ;;  %v1277_v10 = vmul.f32 %v1275_v63, %v1275_v63  ;;  %v3165_v3 = vld [vmem:[%s3976_s29 + $0x30] sm:$0xff]  }
 0xc99   :  { %v1279_v11 = vsel %vm104_vm1, %v1277_v10, 0.0  ;;  %v1278_v12 = vmul.f32 %v1276_v6, %v1276_v6  ;;  %v3166_v10 = vld [vmem:[%s3976_s29 + $0x38] sm:$0xff]  }
 0xc9a   :  { %1280 = vadd.xlane.f32.xlu1 %v1279_v11  ;;  %v3167_v11 = vld [vmem:[%s3951_s9 + $0x30] sm:$0xff]  }
 0xc9b   :  { %v1282_v0 = vsel %vm104_vm1, %v1278_v12, 0.0  ;;  %v3168_v12 = vld [vmem:[%s3951_s9 + $0x38] sm:$0xff]  }
 0xc9e   :  { %1283 = vadd.xlane.f32.xlu1 %v1282_v0 }
 0xd27   :  { %v1281_v17 = vpop.xlane.xlu1 %1280 }
 0xd28   :  { %v1285_v20 = vmul.f32 0.03125, %v1281_v17 }
 0xd2a   :  { %v1287_v21 = vadd.f32 1e-05, %v1285_v20 }
 0xd2b   :  { %v1284_v22 = vpop.xlane.xlu1 %1283 }
 0xd2c   :  { %3203 = vrsqrt.f32 %v1287_v21  ;;  %v1286_v16 = vmul.f32 0.03125, %v1284_v22 }
 0xd2e   :  { %v1288_v18 = vadd.f32 1e-05, %v1286_v16  ;;  %v2657_v16 = vld [vmem:[%s3948_s6 + $0x3] ss:$0 sm:$0xff] }
 0xd30   :  { %3205 = vrsqrt.f32 %v1288_v18 }
 0xd36   :  { %v3204_v19 = vpop.eup %3203 }
 0xd37   :  { %v1291_v24 = vmul.f32 %v3204_v19, %v1275_v63 }
 0xd39   :  { %v1299_v25 = vmul.f32 %v2619_v23, %v1291_v24 }
 0xd3a   :  { %v3206_v26 = vpop.eup %3205 }
 0xd3b   :  { %v1292_v29 = vmul.f32 %v3206_v26, %v1276_v6  ;;  %v1307_v30 = vadd.f32 %v2620_v27, %v1299_v25 }
 0xd3d   :  { %v1300_v31 = vmul.f32 %v2619_v23, %v1292_v29  ;;  %v3696_v34 = vmul.f32 %v1307_v30, %v3575_v61  ;;  %v2675_v30 = vld [vmem:[%s3952_s10 + $0x3] ss:$0 sm:$0xff] }
 0xd3f   :  { %v1308_v33 = vadd.f32 %v2620_v27, %v1300_v31 }
 0xd41   :  { %v3699_v35 = vmul.f32 %v1308_v33, %v3577_v62 }
 0xd43   :  { %v3706_v37 = vpack.c.bf16 %v3699_v35, %v3696_v34 }
 0xd45   :  { %2968 = vmatmul.mubr.msk.bf16.vlgmr.msra.gmra.mrb[32].mxu1 %vm104_vm1, %v3706_v37  ;;  %2976 = vmatmul.mubr.msk.bf16.vlgmr.msra.gmra.mrb[32].mxu0 %vm104_vm1, %v3706_v37 }
 0xd46   :  { %2980 = vmatpush3.bf16.msra.mxu1 %v3163_v36  ;;  %2983 = vmatprep.mubr.msk.bf16.mxu1 %vm3256_vm0, %v3255_v1 }
 0xd47   :  { %2981 = vmatprep.subr.bf16.mxu1 %v3255_v1  ;;  %2989 = vmatprep.mubr.msk.bf16.mxu0 %vm3256_vm0, %v3255_v1 }
 0xd4a   :  { %2982 = vmatpush3.bf16.msra.mxu1 %v3164_v38 }
 0xd4b   :  { %2993 = vmatprep.subr.bf16.mxu1 %v3255_v1 }
 0xd4d   :  { %2984 = vmatmul.mubr.msk.bf16.vlgmr.msra.gmra.mrb[36].mxu1 %vm104_vm1, %v3706_v37 }
 0xd4e   :  { %2995 = vmatprep.mubr.msk.bf16.mxu1 %vm3256_vm0, %v3255_v1 }
 0xe18   :  { %v1374_v40 = vpop.f32.mrb[32].mxu1  ;;  %v1440_v4 = vpop.f32.mrb[32].mxu0 }
 0xe19   :  { %v2969_v42 = vpop.f32.mrb[33].mxu1  ;;  %v2977_v5 = vpop.f32.mrb[33].mxu0  ;;  %v1375_v46 = vadd.f32 %v2626_v39, %v1374_v40  ;;  %v1441_v47 = vadd.f32 %v2635_v41, %v1440_v4 }
 0xe1a   :  { %v1377_v43 = vpop.f32.mrb[34].mxu1  ;;  %v1443_v7 = vpop.f32.mrb[34].mxu0 }
 0xe1b   :  { %v1378_v48 = vadd.f32 %v2626_v39, %v1377_v43  ;;  %v1444_v49 = vadd.f32 %v2635_v41, %v1443_v7  ;;  %v2970_v50 = vpop.f32.mrb[35].mxu1  ;;  %v2978_v51 = vpop.f32.mrb[35].mxu0 }
 0xe1d   :  { %v1513_v52 = vpack.c.bf16 %v1378_v48, %v1375_v46  ;;  %v1514_v53 = vpack.c.bf16 %v1444_v49, %v1441_v47 }
 0xe1f   :  { %v1519_v54 = vsel %vm279_vm2, %v1514_v53, 0 }
 0xe20   :  { %v1506_v56 = vpop.f32.mrb[36].mxu1  ;;  %2988 = vmatpush3.bf16.xpose.msra.mxu0 %v1519_v54 }
 0xe21   :  { %v2985_v57 = vpop.f32.mrb[37].mxu1  ;;  %2999 = vmatprep.subr.bf16.mxu0 %v3255_v1  ;;  %v1507_v59 = vadd.f32 %v2644_v55, %v1506_v56 }
 0xe22   :  { %v1509_v58 = vpop.f32.mrb[38].mxu1  ;;  %v3169_v57 = vld [vmem:[%s3949_s7 + $0x30] sm:$0xff]  }
 0xe23   :  { %v1510_v60 = vadd.f32 %v2644_v55, %v1509_v58  ;;  %v2986_v63 = vpop.f32.mrb[39].mxu1 }
 0xe25   :  { %v1589_v6 = vpack.c.bf16 %v1510_v60, %v1507_v59  ;;  %v3170_v59 = vld [vmem:[%s3949_s7 + $0x38] sm:$0xff]  }
 0xe27   :  { %2990 = vmatmul.mubr.msk.bf16.vlgmr.msra.gmra.mrb[36].mxu0 %vm279_vm2, %v1513_v52  ;;  %2994 = vmatpush3.bf16.msra.mxu1 %v1589_v6 }
 0xe28   :  { %3000 = vmatpush3.bf16.msra.mxu0 %v3165_v3  ;;  %3003 = vmatprep.mubr.msk.bf16.mxu0 %vm3256_vm0, %v3255_v1 }
 0xe29   :  { %3001 = vmatprep.subr.bf16.mxu0 %v3255_v1  ;;  %3007 = vmatprep.subr.bf16.mxu1 %v3255_v1 }
 0xe2c   :  { %3002 = vmatpush3.bf16.msra.mxu0 %v3166_v10 }
 0xe2d   :  { %3015 = vmatprep.subr.bf16.mxu0 %v3255_v1 }
 0xe2f   :  { %3004 = vmatmul.mubr.msk.bf16.vlgmr.msra.gmra.mrb[40].mxu0 %vm104_vm1, %v3706_v37 }
 0xe30   :  { %3016 = vmatpush3.bf16.msra.mxu0 %v3167_v11  ;;  %3019 = vmatprep.mubr.msk.bf16.mxu0 %vm3256_vm0, %v3255_v1  ;;  %v2666_v11 = vld [vmem:[%s3950_s8 + $0x3] ss:$0 sm:$0xff] }
 0xe31   :  { %3017 = vmatprep.subr.bf16.mxu0 %v3255_v1 }
 0xe34   :  { %3018 = vmatpush3.bf16.msra.mxu0 %v3168_v12 }
 0xe35   :  { %3029 = vmatprep.subr.bf16.mxu0 %v3255_v1 }
 0xe37   :  { %3020 = vmatmul.mubr.msk.bf16.vlgmr.msra.gmra.mrb[44].mxu0 %vm104_vm1, %v3706_v37 }
 0xe38   :  { %3031 = vmatprep.mubr.msk.bf16.mxu0 %vm3256_vm0, %v3255_v1 }
 0xefa   :  { %v1555_v0 = vpop.f32.mrb[36].mxu0 }
 0xefb   :  { %v1562_v2 = vmul.f32 0.25, %v1555_v0  ;;  %v2991_v13 = vpop.f32.mrb[37].mxu0 }
 0xefc   :  { %v1558_v14 = vpop.f32.mrb[38].mxu0 }
 0xefd   :  { %v1563_v15 = vmul.f32 0.25, %v1558_v14  ;;  %v2992_v17 = vpop.f32.mrb[39].mxu0  ;;  %v1564_v20 = vadd.f32 %v1562_v2, %v3443_v28 }
 0xeff   :  { %v1566_v21 = vsel %vm279_vm2, %v1564_v20, -inf  ;;  %v1565_v22 = vadd.f32 %v1563_v15, %v3448_v32 }
 0xf00   :  { %1567 = vmax.xlane.f32.xlu1 %v1566_v21 }
 0xf01   :  { %v1569_v23 = vsel %vm279_vm2, %v1565_v22, -inf }
 0xf02   :  { %v1697_v18 = vpop.f32.mrb[40].mxu0 }
 0xf03   :  { %v3005_v19 = vpop.f32.mrb[41].mxu0  ;;  %v3771_v25 = vadd.f32 %v2657_v16, %v1697_v18 }
 0xf04   :  { %1570 = vmax.xlane.f32.xlu1 %v1569_v23  ;;  %v1700_v24 = vpop.f32.mrb[42].mxu0 }
 0xf05   :  { %v3773_v26 = vadd.f32 %v2657_v16, %v1700_v24  ;;  %v3006_v27 = vpop.f32.mrb[43].mxu0 }
 0xf07   :  { %v1836_v29 = vpack.c.bf16 %v3773_v26, %v3771_v25 }
 0xf0a   :  { %v1829_v31 = vpop.f32.mrb[44].mxu0 }
 0xf0b   :  { %v3021_v33 = vpop.f32.mrb[45].mxu0  ;;  %v1830_v38 = vadd.f32 %v2675_v30, %v1829_v31 }
 0xf0c   :  { %v1832_v36 = vpop.f32.mrb[46].mxu0 }
 0xf0d   :  { %v1833_v39 = vadd.f32 %v2675_v30, %v1832_v36  ;;  %v3022_v40 = vpop.f32.mrb[47].mxu0 }
 0xf0f   :  { %v1912_v41 = vpack.c.bf16 %v1833_v39, %v1830_v38 }
 0xf11   :  { %3030 = vmatpush3.bf16.msra.mxu0 %v1912_v41 }
 0xf12   :  { %3041 = vmatprep.subr.bf16.mxu0 %v3255_v1 }
 0xf8d   :  { %v1568_v4 = vpop.xlane.xlu1 %1567 }
 0xf8e   :  { %v1572_v42 = vsub.f32 %v1564_v20, %v1568_v4 }
 0xf90   :  { %v1574_v5 = vmul.f32 1.442695, %v1572_v42 }
 0xf91   :  { %v1571_v43 = vpop.xlane.xlu1 %1570 }
 0xf92   :  { %3207 = vpow2.f32 %v1574_v5  ;;  %v1573_v7 = vsub.f32 %v1565_v22, %v1571_v43 }
 0xf94   :  { %v1576_v46 = vmul.f32 1.442695, %v1573_v7  ;;  %v3171_v7 = vld [vmem:[%s3953_s11 + $0x10] sm:$0xff]  }
 0xf96   :  { %3209 = vpow2.f32 %v1576_v46 }
 0xf9c   :  { %v3208_v47 = vpop.eup %3207 }
 0xf9d   :  { %v1578_v48 = vsel %vm279_vm2, %v3208_v47, 0.0 }
 0xf9e   :  { %1579 = vadd.xlane.f32.xlu0 %v1578_v48 }
 0xfa0   :  { %v3210_v49 = vpop.eup %3209 }
 0xfa1   :  { %v1581_v50 = vsel %vm279_vm2, %v3210_v49, 0.0 }
 0xfa2   :  { %1582 = vadd.xlane.f32.xlu1 %v1581_v50 }
0x102b   :  { %v1580_v51 = vpop.xlane.xlu0 %1579 }
0x102c   :  { %3211 = vrcp.f32 %v1580_v51 }
0x102f   :  { %v1583_v52 = vpop.xlane.xlu1 %1582 }
0x1030   :  { %3213 = vrcp.f32 %v1583_v52 }
0x1036   :  { %v3212_v53 = vpop.eup %3211 }
0x1037   :  { %v1586_v55 = vmul.f32 %v3212_v53, %v3208_v47  ;;  %v3172_v47 = vld [vmem:[%s3953_s11 + $0x18] sm:$0xff]  }
0x103a   :  { %v3214_v54 = vpop.eup %3213 }
0x103b   :  { %v1587_v56 = vmul.f32 %v3214_v54, %v3210_v49 }
0x103d   :  { %v1588_v58 = vpack.c.bf16 %v1587_v56, %v1586_v55 }
0x103f   :  { %2996 = vmatmul.mubr.msk.bf16.vlgmr.msra.gmra.mrb[40].mxu1 %vm279_vm2, %v1588_v58  ;;  %v2688_v58 = vld [vmem:[%s3954_s12 + $0x1] ss:$0 sm:$0xff] }
0x1040   :  { %3008 = vmatpush3.bf16.msra.mxu1 %v3169_v57  ;;  %3011 = vmatprep.mubr.msk.bf16.mxu1 %vm3256_vm0, %v3255_v1 }
0x1041   :  { %3009 = vmatprep.subr.bf16.mxu1 %v3255_v1 }
0x1044   :  { %3010 = vmatpush3.bf16.msra.mxu1 %v3170_v59 }
0x1045   :  { %3023 = vmatprep.subr.bf16.mxu1 %v3255_v1 }
0x1047   :  { %3012 = vmatmul.mubr.msk.bf16.vlgmr.msra.gmra.mrb[44].mxu1 %vm104_vm1, %v3706_v37 }
0x1048   :  { %3025 = vmatprep.mubr.msk.bf16.mxu1 %vm3256_vm0, %v3255_v1 }
0x1112   :  { %v1627_v60 = vpop.f32.mrb[40].mxu1 }
0x1113   :  { %v2997_v63 = vpop.f32.mrb[41].mxu1 }
0x1114   :  { %v1630_v3 = vpop.f32.mrb[42].mxu1 }
0x1115   :  { %v1634_v6 = vpack.c.bf16 %v1630_v3, %v1627_v60  ;;  %v2998_v10 = vpop.f32.mrb[43].mxu1 }
0x111a   :  { %v1763_v12 = vpop.f32.mrb[44].mxu1 }
0x111b   :  { %v3013_v0 = vpop.f32.mrb[45].mxu1  ;;  %v1764_v13 = vadd.f32 %v2666_v11, %v1763_v12 }
0x111c   :  { %v1766_v2 = vpop.f32.mrb[46].mxu1 }
0x111d   :  { %v1767_v14 = vadd.f32 %v2666_v11, %v1766_v2  ;;  %v3014_v15 = vpop.f32.mrb[47].mxu1 }
0x111f   :  { %v1837_v17 = vpack.c.bf16 %v1767_v14, %v1764_v13 }
0x1121   :  { %v1842_v37 = vsel %vm279_vm2, %v1837_v17, 0 }
0x1122   :  { %3024 = vmatpush3.bf16.xpose.msra.mxu1 %v1842_v37 }
0x1123   :  { %3035 = vmatprep.subr.bf16.mxu1 %v3255_v1 }
0x1129   :  { %3026 = vmatmul.mubr.msk.bf16.vlgmr.msra.gmra.mrb[48].mxu1 %vm279_vm2, %v1836_v29 }
0x112a   :  { %3037 = vmatprep.mubr.msk.bf16.mxu1 %vm3256_vm0, %v3255_v1  ;;  %3036 = vmatpush3.bf16.msra.mxu1 %v3172_v47 }
0x11fc   :  { %v1878_v20 = vpop.f32.mrb[48].mxu1 }
0x11fd   :  { %v1885_v21 = vmul.f32 0.25, %v1878_v20  ;;  %v3027_v22 = vpop.f32.mrb[49].mxu1 }
0x11fe   :  { %v1881_v16 = vpop.f32.mrb[50].mxu1 }
0x11ff   :  { %v1886_v18 = vmul.f32 0.25, %v1881_v16  ;;  %v3028_v19 = vpop.f32.mrb[51].mxu1  ;;  %v1887_v23 = vadd.f32 %v1885_v21, %v3443_v28 }
0x1201   :  { %v1889_v24 = vsel %vm279_vm2, %v1887_v23, -inf  ;;  %v1888_v25 = vadd.f32 %v1886_v18, %v3448_v32 }
0x1202   :  { %1890 = vmax.xlane.f32.xlu0 %v1889_v24 }
0x1203   :  { %v1892_v26 = vsel %vm279_vm2, %v1888_v25, -inf }
0x1204   :  { %1893 = vmax.xlane.f32.xlu1 %v1892_v26 }
0x128f   :  { %v1891_v27 = vpop.xlane.xlu0 %1890 }
0x1290   :  { %v1895_v29 = vsub.f32 %v1887_v23, %v1891_v27  ;;  %v2691_v27 = vld [vmem:[%s3955_s13 + $0x1] ss:$0 sm:$0xff]  ;;  %s3260_s13 = smov [#allocation2]  }
0x1291   :  { %v1894_v30 = vpop.xlane.xlu1 %1893 }
0x1292   :  { %v1897_v31 = vmul.f32 1.442695, %v1895_v29  ;;  %v1896_v33 = vsub.f32 %v1888_v25, %v1894_v30 }
0x1294   :  { %3215 = vpow2.f32 %v1897_v31  ;;  %v1899_v36 = vmul.f32 1.442695, %v1896_v33  ;;  %v2692_v31 = vld [vmem:[%s3956_s14 + $0x1] ss:$0 sm:$0xff]  ;;  %s2538_s14 = sshll.u32 %s3260_s13, 4  ;;  %s2539_s14 = int_to_ptr.vmem [resolvable:$true] %s2538_s14 }
0x1295   :  { %p3236_p1 = scmp.lt.s32.totalorder %s2539_s14, %s2539_s14 }
0x1296   :  { %3217 = vpow2.f32 %v1899_v36 }
0x129e   :  { %v3216_v38 = vpop.eup %3215 }
0x129f   :  { %v1901_v39 = vsel %vm279_vm2, %v3216_v38, 0.0 }
0x12a0   :  { %v3218_v28 = vpop.eup %3217  ;;  %1902 = vadd.xlane.f32.xlu0 %v1901_v39 }
0x12a1   :  { %v1904_v40 = vsel %vm279_vm2, %v3218_v28, 0.0 }
0x12a2   :  { %1905 = vadd.xlane.f32.xlu1 %v1904_v40 }
0x132d   :  { %v1903_v32 = vpop.xlane.xlu0 %1902 }
0x132e   :  { %3219 = vrcp.f32 %v1903_v32 }
0x132f   :  { %v1906_v41 = vpop.xlane.xlu1 %1905 }
0x1330   :  { %3221 = vrcp.f32 %v1906_v41 }
0x1338   :  { %v3220_v4 = vpop.eup %3219 }
0x1339   :  { %v1909_v5 = vmul.f32 %v3220_v4, %v3216_v38 }
0x133a   :  { %v3222_v42 = vpop.eup %3221 }
0x133b   :  { %v1910_v43 = vmul.f32 %v3222_v42, %v3218_v28  ;;  %v3173_v42 = vld [vmem:[%s3957_s15 + $0x30] sm:$0xff]  }
0x133d   :  { %v1911_v46 = vpack.c.bf16 %v1910_v43, %v1909_v5  ;;  %v3177_v5 = vld [vmem:[%s3957_s15 + $0x50] sm:$0xff]   ;;  %v3178_v43 = vld [vmem:[%s3957_s15 + $0x58] sm:$0xff]  }
0x133f   :  { %3032 = vmatmul.mubr.msk.bf16.vlgmr.msra.gmra.mrb[48].mxu0 %vm279_vm2, %v1911_v46  ;;  %v3179_v46 = vld [vmem:[%s3959_s17 + $0x20] sm:$0xff]  }
0x1340   :  { %3042 = vmatpush3.bf16.msra.mxu0 %v3171_v7  ;;  %3043 = vmatprep.mubr.msk.bf16.mxu0 %vm3256_vm0, %v3255_v1 }
0x1341   :  { %3061 = vmatprep.subr.bf16.mxu0 %v3255_v1 }
0x1347   :  { %3044 = vmatmul.mubr.msk.bf16.vlgmr.msra.gmra.mrb[52].mxu0 %vm279_vm2, %v1634_v6 }
0x1348   :  { %3073 = vmatprep.mubr.msk.bf16.mxu0 %vm3256_vm0, %v3255_v1  ;;  %3062 = vmatpush3.bf16.msra.mxu0 %v3173_v42 }
0x1349   :  { %3063 = vmatprep.subr.bf16.mxu0 %v3255_v1 }
0x1412   :  { %v1950_v48 = vpop.f32.mrb[48].mxu0 }
0x1413   :  { %v3033_v49 = vpop.f32.mrb[49].mxu0 }
0x1414   :  { %v1953_v50 = vpop.f32.mrb[50].mxu0 }
0x1415   :  { %v1957_v51 = vpack.c.bf16 %v1953_v50, %v1950_v48  ;;  %v3034_v52 = vpop.f32.mrb[51].mxu0  ;;  %v3180_v48 = vld [vmem:[%s3959_s17 + $0x28] sm:$0xff]  }
0x1417   :  { %3038 = vmatmul.mubr.msk.bf16.vlgmr.msra.gmra.mrb[52].mxu1 %vm279_vm2, %v1957_v51 }
0x1418   :  { %3051 = vmatprep.mubr.msk.f32.mxu1 %vm279_vm2, %v3558_v44 }
0x141a   :  { %v2054_v53 = vpop.f32.mrb[52].mxu0 }
0x141b   :  { %v3045_v54 = vpop.f32.mrb[53].mxu0 }
0x141c   :  { %v2057_v55 = vpop.f32.mrb[54].mxu0 }
0x141d   :  { %v3046_v56 = vpop.f32.mrb[55].mxu0 }
0x14ea   :  { %v2004_v57 = vpop.f32.mrb[52].mxu1 }
0x14eb   :  { %v2055_v59 = vadd.f32 %v2054_v53, %v2004_v57  ;;  %v3039_v60 = vpop.f32.mrb[53].mxu1 }
0x14ec   :  { %v2007_v63 = vpop.f32.mrb[54].mxu1 }
0x14ed   :  { %v2069_v3 = vadd.f32 %v2688_v58, %v2055_v59  ;;  %v2058_v6 = vadd.f32 %v2057_v55, %v2007_v63  ;;  %v3040_v10 = vpop.f32.mrb[55].mxu1 }
0x14ee   :  { %v3182_v10 = vld [vmem:[%s3959_s17 + $0x38] sm:$0xff]  }
0x14ef   :  { %v2070_v11 = vadd.f32 %v2688_v58, %v2058_v6  ;;  %v2071_v12 = vadd.f32 %v2069_v3, %v3696_v34  ;;  %v3181_v6 = vld [vmem:[%s3959_s17 + $0x30] sm:$0xff]  }
0x14f1   :  { %v2077_v44 = vsel %vm104_vm1, %v2071_v12, 0.0  ;;  %v2072_v0 = vadd.f32 %v2070_v11, %v3699_v35  ;;  %v2710_v11 = vld [vmem:[%s3958_s16 + $0x1] ss:$0 sm:$0xff] }
0x14f2   :  { %2078 = vadd.xlane.f32.xlu0 %v2077_v44 }
0x14f3   :  { %v2080_v2 = vsel %vm104_vm1, %v2072_v0, 0.0 }
0x14f4   :  { %2081 = vadd.xlane.f32.xlu1 %v2080_v2 }
0x157f   :  { %v2079_v13 = vpop.xlane.xlu0 %2078 }
0x1580   :  { %v2083_v14 = vmul.f32 0.03125, %v2079_v13 }
0x1581   :  { %v2082_v15 = vpop.xlane.xlu1 %2081 }
0x1582   :  { %v2085_v17 = vsub.f32 %v2071_v12, %v2083_v14  ;;  %v2084_v37 = vmul.f32 0.03125, %v2082_v15 }
0x1584   :  { %v2086_v20 = vsub.f32 %v2072_v0, %v2084_v37  ;;  %v2087_v21 = vmul.f32 %v2085_v17, %v2085_v17 }
0x1586   :  { %v2089_v22 = vsel %vm104_vm1, %v2087_v21, 0.0  ;;  %v2088_v16 = vmul.f32 %v2086_v20, %v2086_v20 }
0x1587   :  { %2090 = vadd.xlane.f32.xlu0 %v2089_v22 }
0x1588   :  { %v2092_v34 = vsel %vm104_vm1, %v2088_v16, 0.0 }
0x1589   :  { %2093 = vadd.xlane.f32.xlu1 %v2092_v34 }
0x1614   :  { %v2091_v18 = vpop.xlane.xlu0 %2090 }
0x1615   :  { %v2095_v35 = vmul.f32 0.03125, %v2091_v18 }
0x1616   :  { %v2094_v19 = vpop.xlane.xlu1 %2093 }
0x1617   :  { %v2097_v23 = vadd.f32 1e-05, %v2095_v35  ;;  %v2096_v24 = vmul.f32 0.03125, %v2094_v19 }
0x1619   :  { %3223 = vrsqrt.f32 %v2097_v23  ;;  %v2098_v25 = vadd.f32 1e-05, %v2096_v24 }
0x161b   :  { %3225 = vrsqrt.f32 %v2098_v25 }
0x1623   :  { %v3224_v26 = vpop.eup %3223 }
0x1624   :  { %v2101_v29 = vmul.f32 %v3224_v26, %v2085_v17 }
0x1625   :  { %v3226_v30 = vpop.eup %3225 }
0x1626   :  { %v2102_v33 = vmul.f32 %v3226_v30, %v2086_v20  ;;  %v2109_v36 = vmul.f32 %v2691_v27, %v2101_v29 }
0x1628   :  { %v2110_v38 = vmul.f32 %v2691_v27, %v2102_v33  ;;  %v2117_v39 = vadd.f32 %v2692_v31, %v2109_v36 }
0x162a   :  { %v2118_v28 = vadd.f32 %v2692_v31, %v2110_v38  ;;  %v3844_v40 = vmul.f32 %v2117_v39, %v3575_v61 }
0x162c   :  { %v3847_v32 = vmul.f32 %v2118_v28, %v3577_v62 }
0x162e   :  { %v3125_v41 = vpack.i.bf16 %v3847_v32, %v3844_v40  ;;  %v3097_v4 = vpack.c.bf16 %v3847_v32, %v3844_v40 }
0x1630   :  { %3126 = vrot.lane.b32.xlu0 %v3125_v41, %s3258_s23  ;;  %3098 = vmatprep.subr.bf16.mxu1 %v3097_v4 }
0x1631   :  { %3100 = vmatpush3.bf16.msra.mxu1 %v3097_v4 }
0x1632   :  { %3102 = vmatprep.subr.bf16.mxu1 %v3097_v4 }
0x1634   :  { %3052 = vmatmul.mubr.msk.f32.vlgmr.msra.gmra.mrb[26].mxu1 %vm279_vm2, %v3593_v8  ;;  %v3174_v8 = vld [vmem:[%s3957_s15 + $0x38] sm:$0xff]  }
0x1635   :  { %3104 = vmatpush3.bf16.msra.mxu1 %v3097_v4  ;;  %3058 = vmatprep.mubr.msk.f32.mxu1 %vm279_vm2, %v3563_v45  ;;  %v3175_v45 = vld [vmem:[%s3957_s15 + $0x40] sm:$0xff]  }
0x1636   :  { %3077 = vmatprep.subr.bf16.mxu1 %v3255_v1  ;;  %3064 = vmatpush3.bf16.msra.mxu0 %v3174_v8 }
0x1637   :  { %3065 = vmatprep.subr.bf16.mxu0 %v3255_v1 }
0x1638   :  { %3059 = vmatmul.mubr.msk.f32.vlgmr.msra.gmra.mrb[56].mxu1 %vm279_vm2, %v3598_v9  ;;  %v3176_v9 = vld [vmem:[%s3957_s15 + $0x48] sm:$0xff]  }
0x1639   :  { %3085 = vmatprep.mubr.msk.bf16.mxu1 %vm3256_vm0, %v3255_v1  ;;  %3078 = vmatpush3.bf16.msra.mxu1 %v3179_v46 }
0x163a   :  { %3066 = vmatpush3.bf16.msra.mxu0 %v3175_v45  ;;  %3079 = vmatprep.subr.bf16.mxu1 %v3255_v1  ;;  %v2735_v45 = vld [vmem:[%s3961_s19 + $0x1] ss:$0 sm:$0xff]  ;;  %s3231_s19 = scalar_lea.vmem %s2539_s14, 256 }
0x163b   :  { %3067 = vmatprep.subr.bf16.mxu0 %v3255_v1  ;;  %p3232_p0 = scmp.ne.s32.totalorder %s2539_s14, %s3231_s19  ;;  %p3237_p2 = scmp.lt.s32.totalorder %s3231_s19, %s3231_s19 }
0x163d   :  { %3080 = vmatpush3.bf16.msra.mxu1 %v3180_v48  ;;  %p3238_p3 = por %p3237_p2, %p3236_p1 }
0x163e   :  { %3068 = vmatpush3.bf16.msra.mxu0 %v3176_v9  ;;  %3081 = vmatprep.subr.bf16.mxu1 %v3255_v1 }
0x163f   :  { %3069 = vmatprep.subr.bf16.mxu0 %v3255_v1  ;;  %p3239_p4 = pnand %p3238_p3, %p3232_p0 }
0x1641   :  { %3082 = vmatpush3.bf16.msra.mxu1 %v3181_v6 }
0x1642   :  { %3070 = vmatpush3.bf16.msra.mxu0 %v3177_v5  ;;  %3083 = vmatprep.subr.bf16.mxu1 %v3255_v1 }
0x1643   :  { %3071 = vmatprep.subr.bf16.mxu0 %v3255_v1  ;;  %v2727_v1 = vld [vmem:[%s3960_s18 + $0x1] ss:$0 sm:$0xff] }
0x1645   :  { %3084 = vmatpush3.bf16.msra.mxu1 %v3182_v10 }
0x1646   :  { %3072 = vmatpush3.bf16.msra.mxu0 %v3178_v43  ;;  %v2736_v43 = vld [vmem:[%s3962_s20 + $0x1] ss:$0 sm:$0xff] }
0x16a2   :  { %v3127_v52 = vpop.permute.xlu0 %3126 }
0x16a3   :  { %v3129_v53 = vunpack.i.h.bf16 %v3127_v52  ;;  %v3128_v54 = vunpack.i.l.bf16 %v3127_v52 }
0x1707   :  { %v3053_v7 = vpop.f32.mrb[26].mxu1 }
0x1708   :  { %v2187_v47 = vpop.f32.mrb[27].mxu1  ;;  %v2288_v58 = vsel %vm104_vm1, %v3053_v7, %v3129_v53 }
0x1709   :  { %v2287_v59 = vsel %vm104_vm1, %v2187_v47, %v3128_v54 }
0x170b   :  { %v3060_v49 = vpop.f32.mrb[56].mxu1 }
0x170c   :  { %v2262_v50 = vpop.f32.mrb[57].mxu1 }
0x170d   :  { %v3130_v51 = vpack.i.bf16 %v3060_v49, %v2262_v50 }
0x170f   :  { %3131 = vrot.lane.b32.xlu1 %v3130_v51, %s3259_s28 }
0x1781   :  { %v3132_v55 = vpop.permute.xlu1 %3131 }
0x1782   :  { %v3134_v56 = vunpack.i.h.bf16 %v3132_v55  ;;  %v3133_v57 = vunpack.i.l.bf16 %v3132_v55 }
0x1784   :  { %v2290_v60 = vsel %vm1073_vm3, %v2288_v58, %v3134_v56  ;;  %v2289_v63 = vsel %vm1073_vm3, %v2287_v59, %v3133_v57 }
0x1785   :  { %v2291_v3 = vpack.c.bf16 %v2290_v60, %v2289_v63 }
0x1787   :  { %3074 = vmatmul.mubr.msk.bf16.vlgmr.msra.gmra.mrb[56].mxu0 %vm1132_vm4, %v2291_v3 }
0x185a   :  { %v2386_v12 = vpop.f32.mrb[56].mxu0 }
0x185b   :  { %v2387_v44 = vadd.f32 %v2710_v11, %v2386_v12  ;;  %v3075_v0 = vpop.f32.mrb[57].mxu0 }
0x185c   :  { %v2389_v2 = vpop.f32.mrb[58].mxu0 }
0x185d   :  { %v2390_v13 = vadd.f32 %v2710_v11, %v2389_v2  ;;  %v3076_v14 = vpop.f32.mrb[59].mxu0  ;;  %v2393_v15 = vmax.f32 %v2387_v44, 0.0 }
0x185f   :  { %v2394_v17 = vmax.f32 %v2390_v13, 0.0 }
0x1861   :  { %v2395_v37 = vpack.c.bf16 %v2394_v17, %v2393_v15 }
0x1863   :  { %3086 = vmatmul.mubr.msk.bf16.vlgmr.msra.gmra.mrb[60].mxu1 %vm1073_vm3, %v2395_v37 }
0x1936   :  { %v2474_v20 = vpop.f32.mrb[60].mxu1 }
0x1937   :  { %v2475_v21 = vadd.f32 %v2727_v1, %v2474_v20  ;;  %v3087_v22 = vpop.f32.mrb[61].mxu1 }
0x1938   :  { %v2477_v16 = vpop.f32.mrb[62].mxu1 }
0x1939   :  { %v2478_v34 = vadd.f32 %v2727_v1, %v2477_v16  ;;  %v3088_v18 = vpop.f32.mrb[63].mxu1  ;;  %v2481_v35 = vadd.f32 %v2475_v21, %v3844_v40 }
0x193b   :  { %v2487_v19 = vsel %vm104_vm1, %v2481_v35, 0.0  ;;  %v2482_v23 = vadd.f32 %v2478_v34, %v3847_v32 }
0x193c   :  { %2488 = vadd.xlane.f32.xlu1 %v2487_v19 }
0x193d   :  { %v2490_v24 = vsel %vm104_vm1, %v2482_v23, 0.0 }
0x193e   :  { %2491 = vadd.xlane.f32.xlu0 %v2490_v24 }
0x19c9   :  { %v2489_v25 = vpop.xlane.xlu1 %2488 }
0x19ca   :  { %v2493_v26 = vmul.f32 0.03125, %v2489_v25 }
0x19cb   :  { %v2492_v27 = vpop.xlane.xlu0 %2491 }
0x19cc   :  { %v2495_v29 = vsub.f32 %v2481_v35, %v2493_v26  ;;  %v2494_v30 = vmul.f32 0.03125, %v2492_v27 }
0x19ce   :  { %v2496_v31 = vsub.f32 %v2482_v23, %v2494_v30  ;;  %v2497_v33 = vmul.f32 %v2495_v29, %v2495_v29 }
0x19d0   :  { %v2499_v36 = vsel %vm104_vm1, %v2497_v33, 0.0  ;;  %v2498_v38 = vmul.f32 %v2496_v31, %v2496_v31 }
0x19d1   :  { %2500 = vadd.xlane.f32.xlu0 %v2499_v36 }
0x19d2   :  { %v2502_v39 = vsel %vm104_vm1, %v2498_v38, 0.0 }
0x19d3   :  { %2503 = vadd.xlane.f32.xlu1 %v2502_v39 }
0x1a5e   :  { %v2501_v28 = vpop.xlane.xlu0 %2500 }
0x1a5f   :  { %v2505_v40 = vmul.f32 0.03125, %v2501_v28 }
0x1a60   :  { %v2504_v32 = vpop.xlane.xlu1 %2503 }
0x1a61   :  { %v2507_v41 = vadd.f32 1e-05, %v2505_v40  ;;  %v2506_v4 = vmul.f32 0.03125, %v2504_v32 }
0x1a63   :  { %3227 = vrsqrt.f32 %v2507_v41  ;;  %v2508_v42 = vadd.f32 1e-05, %v2506_v4 }
0x1a65   :  { %3229 = vrsqrt.f32 %v2508_v42 }
0x1a6d   :  { %v3228_v8 = vpop.eup %3227 }
0x1a6e   :  { %v2511_v9 = vmul.f32 %v3228_v8, %v2495_v29 }
0x1a6f   :  { %v3230_v5 = vpop.eup %3229 }
0x1a70   :  { %v2519_v7 = vmul.f32 %v2735_v45, %v2511_v9  ;;  %v2512_v46 = vmul.f32 %v3230_v5, %v2496_v31 }
0x1a72   :  { %v2520_v47 = vmul.f32 %v2735_v45, %v2512_v46  ;;  %v2527_v48 = vadd.f32 %v2736_v43, %v2519_v7 }
0x1a74   :  { %v2528_v49 = vadd.f32 %v2736_v43, %v2520_v47  ;;  %v2529_v50 = vmul.f32 %v2527_v48, %v3575_v61 }
0x1a76   :  { %v2530_v51 = vmul.f32 %v2528_v49, %v3577_v62  ;;  %2531 = vst.msk [vmem:[#allocation2] sm:$0xff] %vm104_vm1, %v2529_v50 }
0x1a78   :  { %2532 = vst.msk [vmem:[#allocation2 + $0x8] sm:$0xff] %vm104_vm1, %v2530_v51 }
0x1a79   :  { %3242 = shalt.err (!%p3239_p4)
}
0x1a7a   :  { %s3243_s9 = scalar_lea.hbm %s3963_s21, 256 }
0x1a7b   :  { %p3244_p5 = scmp.ne.s32.totalorder %s3963_s21, %s3243_s9  ;;  %p3247_p6 = scmp.lt.u32.totalorder %s3243_s9, %s3963_s21 }
0x1a7d   :  { %p3249_p7 = pnand %p3247_p6, %p3244_p5 }
0x1a7f   :  { %3252 = shalt.err (!%p3249_p7)
}
0x1a80   :  { %s3261_s10 = smov 128   ;;  %s3262_s22 = smov 8  }
0x1a81   :  { %2544 = dma.vmem_to_hbm [thread:$0]  %s2539_s14, 256, %s3963_s21, [#allocation3], %s3261_s10, %s3261_s10, %s3262_s22  }
0x1a82   :  { %3253 = dma.done.wait [#allocation3], 256  }
0x1a83   :  { %3254 = vsyncadd [#allocation3], 4294967040 }
0x1a84   :  { %2548 = vsyncpa [#allocation3], 1 }

</bundles_post_ra>
